<compile_context>
chip_gen: v6e
topology: v6e:2x2x1
jax: 0.10.0
libtpu: 0.0.40
codegen_flags: <defaults>
</compile_context>

<pallas_src>
import functools

import jax
import jax.numpy as jnp
from jax.experimental import pallas as pl
from jax.experimental.pallas import tpu as pltpu


def _round_up(x, m):
    return ((x + m - 1) // m) * m


# ---------------------------------------------------------------------------
# Pallas kernel 1: fused  out = maybe_relu( x @ w + shift )
#   x: (bm, Kp) bf16   w: (Kp, Np) bf16 (BN scale folded in)   shift: (1, Np) f32
# ---------------------------------------------------------------------------
def _matmul_bias_act_kernel(x_ref, w_ref, shift_ref, o_ref, *, apply_relu):
    acc = jnp.dot(x_ref[...], w_ref[...], preferred_element_type=jnp.float32)
    acc = acc + shift_ref[...]                 # broadcast (1, Np) over rows
    if apply_relu:
        acc = jnp.maximum(acc, 0.0)
    o_ref[...] = acc.astype(o_ref.dtype)


def fused_matmul_bias_act(x_bf, w_bf, shift, *, apply_relu, block_m=512):
    """x_bf: (M, K) bf16, w_bf: (Kp, Np) bf16 pre-padded, shift: (1, Np) f32.

    Returns the padded, lane-dense (Mp, Np) f32 result; caller slices."""
    M, K = x_bf.shape
    Kp, Np = w_bf.shape
    assert K <= Kp and Kp % 128 == 0 and Np % 128 == 0

    bm = min(block_m, _round_up(M, 16))
    Mp = _round_up(M, bm)
    if Mp != M or Kp != K:
        x_bf = jnp.pad(x_bf, ((0, Mp - M), (0, Kp - K)))

    cost = pl.CostEstimate(
        flops=2 * Mp * Kp * Np,
        transcendentals=0,
        bytes_accessed=Mp * Kp * 2 + Kp * Np * 2 + Np * 4 + Mp * Np * 4,
    )
    return pl.pallas_call(
        functools.partial(_matmul_bias_act_kernel, apply_relu=apply_relu),
        out_shape=jax.ShapeDtypeStruct((Mp, Np), jnp.float32),
        grid=(Mp // bm,),
        in_specs=[
            pl.BlockSpec((bm, Kp), lambda i: (i, 0)),
            pl.BlockSpec((Kp, Np), lambda i: (0, 0)),
            pl.BlockSpec((1, Np), lambda i: (0, 0)),
        ],
        out_specs=pl.BlockSpec((bm, Np), lambda i: (i, 0)),
        compiler_params=pltpu.CompilerParams(
            dimension_semantics=("parallel",),
            vmem_limit_bytes=32 * 1024 * 1024,
        ),
        cost_estimate=cost,
    )(x_bf, w_bf, shift)


# ---------------------------------------------------------------------------
# Pallas kernel 2: fused FC head   out = relu(x @ w1 + b1) @ w2 + b2
# ---------------------------------------------------------------------------
def _fc_head_kernel(x_ref, w1_ref, b1_ref, w2_ref, b2_ref, o_ref, h_ref):
    h = jnp.dot(x_ref[...], w1_ref[...], preferred_element_type=jnp.float32)
    h_ref[...] = jnp.maximum(h + b1_ref[...], 0.0).astype(h_ref.dtype)
    out = jnp.dot(h_ref[...], w2_ref[...], preferred_element_type=jnp.float32)
    o_ref[...] = (out + b2_ref[...]).astype(o_ref.dtype)


def fused_fc_head(x_bf, w1_bf, b1, w2_bf, b2, *, block_m=256):
    """x_bf: (B, K) bf16, w1_bf: (K1p, H) bf16, w2_bf: (H, Op) bf16."""
    B, K = x_bf.shape
    K1p, H = w1_bf.shape
    H2, Op = w2_bf.shape
    assert H == H2 and K <= K1p

    bm = min(block_m, _round_up(B, 16))
    Bp = _round_up(B, bm)
    if Bp != B or K1p != K:
        x_bf = jnp.pad(x_bf, ((0, Bp - B), (0, K1p - K)))

    cost = pl.CostEstimate(
        flops=2 * Bp * (K1p * H + H * Op),
        transcendentals=0,
        bytes_accessed=Bp * K1p * 2 + K1p * H * 2 + H * Op * 2 + Bp * Op * 4,
    )
    return pl.pallas_call(
        _fc_head_kernel,
        out_shape=jax.ShapeDtypeStruct((Bp, Op), jnp.float32),
        grid=(Bp // bm,),
        in_specs=[
            pl.BlockSpec((bm, K1p), lambda i: (i, 0)),
            pl.BlockSpec((K1p, H), lambda i: (0, 0)),
            pl.BlockSpec((1, H), lambda i: (0, 0)),
            pl.BlockSpec((H, Op), lambda i: (0, 0)),
            pl.BlockSpec((1, Op), lambda i: (0, 0)),
        ],
        out_specs=pl.BlockSpec((bm, Op), lambda i: (i, 0)),
        scratch_shapes=[pltpu.VMEM((bm, H), jnp.bfloat16)],
        compiler_params=pltpu.CompilerParams(
            dimension_semantics=("parallel",),
            vmem_limit_bytes=32 * 1024 * 1024,
        ),
        cost_estimate=cost,
    )(x_bf, w1_bf, b1, w2_bf, b2)


# ---------------------------------------------------------------------------
# Glue: NHWC im2col -> (N*Ho*Wo, kh*kw*Cin), K ordering (kh, kw, Cin).
# ---------------------------------------------------------------------------
def im2col_nhwc(x, kh, kw, stride):
    N, H, W, C = x.shape
    Ho = (H - kh) // stride + 1
    Wo = (W - kw) // stride + 1
    cols = []
    for i in range(kh):
        for j in range(kw):
            cols.append(x[:, i:i + stride * Ho:stride, j:j + stride * Wo:stride, :])
    patches = jnp.stack(cols, axis=3)                       # (N, Ho, Wo, kh*kw, C)
    return patches.reshape(N * Ho * Wo, kh * kw * C), Ho, Wo


# Architecture constants (kernel_size, stride, out_channels) per conv layer.
CONV_CFG = ((8, 4, 32), (4, 2, 64), (3, 1, 64))


# ---------------------------------------------------------------------------
# DQN forward (kernel path).  `prep` holds only pre-processed arrays.
# ---------------------------------------------------------------------------
def dqn_forward(x_nchw, prep, *, outputs):
    n = x_nchw.shape[0]
    x = jnp.transpose(x_nchw, (0, 2, 3, 1))                 # NCHW -> NHWC, once
    for li, (k, s, cout) in enumerate(CONV_CFG):
        patches, Ho, Wo = im2col_nhwc(x, k, k, s)
        out = fused_matmul_bias_act(
            patches.astype(jnp.bfloat16), prep[f"cw{li}"], prep[f"cs{li}"],
            apply_relu=True)
        x = out[: n * Ho * Wo, :cout].reshape(n, Ho, Wo, cout)
    flat = x.reshape(n, -1)                                  # NHWC flatten (lw1 permuted to match)
    q = fused_fc_head(flat.astype(jnp.bfloat16), prep["lw1"], prep["lb1"],
                      prep["lw2"], prep["lb2"])
    return q[:n, :outputs]


# ---------------------------------------------------------------------------
# Parameter preparation: fold BN into weights, permute for NHWC, pad, cast bf16.
# ---------------------------------------------------------------------------
def prepare_params(p, h, w, outputs, eps=1e-5):
    def conv_size(s, k, st):
        return (s - (k - 1) - 1) // st + 1

    prep = {}
    for li, sfx in enumerate(("1", "2", "3")):
        wt = p[f"w{sfx}"]                                    # (Cout, Cin, kh, kw)
        cout, cin, kh, kw = wt.shape
        scale = p[f"g{sfx}"] / jnp.sqrt(p[f"v{sfx}"] + eps)
        shift = p[f"be{sfx}"] + (p[f"b{sfx}"] - p[f"m{sfx}"]) * scale
        w_mat = wt.transpose(2, 3, 1, 0).reshape(kh * kw * cin, cout)   # K order (kh, kw, cin)
        w_mat = w_mat * scale[None, :]                       # fold BN scale into weights
        Kp = _round_up(kh * kw * cin, 128)
        Np = _round_up(cout, 128)
        w_mat = jnp.pad(w_mat, ((0, Kp - kh * kw * cin), (0, Np - cout)))
        prep[f"cw{li}"] = w_mat.astype(jnp.bfloat16)
        prep[f"cs{li}"] = jnp.pad(shift, (0, Np - cout)).reshape(1, Np).astype(jnp.float32)

    convw = conv_size(conv_size(conv_size(w, 8, 4), 4, 2), 3, 1)
    convh = conv_size(conv_size(conv_size(h, 8, 4), 4, 2), 3, 1)
    c3 = CONV_CFG[-1][2]
    lin_in = convh * convw * c3
    # Permute fc1 columns from PyTorch NCHW flatten (c,h,w) to NHWC flatten (h,w,c).
    lw1 = p["lw1"].reshape(512, c3, convh, convw).transpose(0, 2, 3, 1).reshape(512, lin_in)
    K1p = _round_up(lin_in, 128)
    prep["lw1"] = jnp.pad(lw1.T, ((0, K1p - lin_in), (0, 0))).astype(jnp.bfloat16)
    prep["lb1"] = p["lb1"].reshape(1, 512).astype(jnp.float32)
    Op = _round_up(outputs, 128)
    prep["lw2"] = jnp.pad(p["lw2"].T, ((0, 0), (0, Op - outputs))).astype(jnp.bfloat16)
    prep["lb2"] = jnp.pad(p["lb2"], (0, Op - outputs)).reshape(1, Op).astype(jnp.float32)
    return prep


# ---------------------------------------------------------------------------
# Pure-JAX reference (f32, PyTorch layout/semantics) for validation.
# ---------------------------------------------------------------------------
def reference_forward(x, p, eps=1e-5):
    def im2col_nchw(x, kh, kw, stride):
        N, C, H, W = x.shape
        Ho = (H - kh) // stride + 1
        Wo = (W - kw) // stride + 1
        cols = []
        for i in range(kh):
            for j in range(kw):
                cols.append(x[:, :, i:i + stride * Ho:stride, j:j + stride * Wo:stride])
        patches = jnp.stack(cols, axis=2).reshape(N, C * kh * kw, Ho, Wo)
        return patches.transpose(0, 2, 3, 1).reshape(N * Ho * Wo, C * kh * kw), Ho, Wo

    def conv_bn_relu(x, wt, b, g, be, m, v, stride):
        N = x.shape[0]
        cout, cin, kh, kw = wt.shape
        patches, Ho, Wo = im2col_nchw(x, kh, kw, stride)
        out = patches @ wt.reshape(cout, cin * kh * kw).T + b
        out = (out - m) / jnp.sqrt(v + eps) * g + be
        out = jnp.maximum(out, 0.0)
        return out.reshape(N, Ho, Wo, cout).transpose(0, 3, 1, 2)

    x = conv_bn_relu(x, p["w1"], p["b1"], p["g1"], p["be1"], p["m1"], p["v1"], 4)
    x = conv_bn_relu(x, p["w2"], p["b2"], p["g2"], p["be2"], p["m2"], p["v2"], 2)
    x = conv_bn_relu(x, p["w3"], p["b3"], p["g3"], p["be3"], p["m3"], p["v3"], 1)
    n = x.shape[0]
    x = x.reshape(n, -1)
    x = jnp.maximum(x @ p["lw1"].T + p["lb1"], 0.0)
    return x @ p["lw2"].T + p["lb2"]


# ---------------------------------------------------------------------------
# Parameter construction (PyTorch layouts).
# ---------------------------------------------------------------------------
def make_params(key, h, w, outputs):
    def conv_size(s, k, st):
        return (s - (k - 1) - 1) // st + 1

    convw = conv_size(conv_size(conv_size(w, 8, 4), 4, 2), 3, 1)
    convh = conv_size(conv_size(conv_size(h, 8, 4), 4, 2), 3, 1)
    lin_in = convw * convh * 64

    keys = jax.random.split(key, 16)
    f32 = jnp.float32

    def normal(k, shape, s=0.05):
        return (s * jax.random.normal(k, shape)).astype(f32)

    return {
        "w1": normal(keys[0], (32, 4, 8, 8)),    "b1": normal(keys[1], (32,)),
        "g1": 1.0 + normal(keys[2], (32,)),      "be1": normal(keys[3], (32,)),
        "m1": jnp.zeros((32,), f32),             "v1": jnp.ones((32,), f32),
        "w2": normal(keys[4], (64, 32, 4, 4)),   "b2": normal(keys[5], (64,)),
        "g2": 1.0 + normal(keys[6], (64,)),      "be2": normal(keys[7], (64,)),
        "m2": jnp.zeros((64,), f32),             "v2": jnp.ones((64,), f32),
        "w3": normal(keys[8], (64, 64, 3, 3)),   "b3": normal(keys[9], (64,)),
        "g3": 1.0 + normal(keys[10], (64,)),     "be3": normal(keys[11], (64,)),
        "m3": jnp.zeros((64,), f32),             "v3": jnp.ones((64,), f32),
        "lw1": normal(keys[12], (512, lin_in)),  "lb1": normal(keys[13], (512,)),
        "lw2": normal(keys[14], (outputs, 512)), "lb2": normal(keys[15], (outputs,)),
    }


if __name__ == "__main__":
    # Small shapes consistent with the module's conv stack:
    # H = W = 52 -> 12 -> 5 -> 3 spatial; linear_input_size = 3*3*64 = 576.
    batch, channels, H, W, outputs = 2, 4, 52, 52, 6

    key = jax.random.PRNGKey(0)
    kx, kp = jax.random.split(key)
    x = jax.random.normal(kx, (batch, channels, H, W), dtype=jnp.float32)
    params = make_params(kp, H, W, outputs)
    prep = prepare_params(params, H, W, outputs)

    fwd = jax.jit(functools.partial(dqn_forward, outputs=outputs))
    out = jax.block_until_ready(fwd(x, prep))
    assert out.shape == (batch, outputs), out.shape

    ref = jax.block_until_ready(jax.jit(reference_forward)(x, params))
    max_err = float(jnp.max(jnp.abs(out - ref)))
    assert max_err < 5e-2, f"max abs err {max_err}"

    print("KERNEL_OK")
</pallas_src>

<mosaic_0001>
module attributes {stable_mosaic.version = 11 : i64} {
  func.func @_matmul_bias_act_kernel(%arg0: i32, %arg1: memref<288x256xbf16, #tpu.memory_space<vmem>>, %arg2: memref<256x128xbf16, #tpu.memory_space<vmem>>, %arg3: memref<1x128xf32, #tpu.memory_space<vmem>>, %arg4: memref<288x128xf32, #tpu.memory_space<vmem>>) attributes {dimension_semantics = [#tpu.dimension_semantics<parallel>], iteration_bounds = array<i64: 1>, scalar_prefetch = 0 : i64, scratch_operands = 0 : i64, tpu.core_type = #tpu.core_type<tc>, window_params = [{transform_indices = @transform_0, window_bounds = array<i64: 288, 256>}, {pipeline_mode = #tpu.pipeline_mode<synchronous>, transform_indices = @transform_1, window_bounds = array<i64: 256, 128>}, {pipeline_mode = #tpu.pipeline_mode<synchronous>, transform_indices = @transform_2, window_bounds = array<i64: 1, 128>}, {transform_indices = @transform_3, window_bounds = array<i64: 288, 128>}]} {
    %c0 = arith.constant 0 : index
    %c0_0 = arith.constant 0 : index
    %0 = vector.load %arg1[%c0, %c0_0] : memref<288x256xbf16, #tpu.memory_space<vmem>>, vector<288x256xbf16>
    %c0_1 = arith.constant 0 : index
    %c0_2 = arith.constant 0 : index
    %1 = vector.load %arg2[%c0_1, %c0_2] : memref<256x128xbf16, #tpu.memory_space<vmem>>, vector<256x128xbf16>
    %cst = arith.constant dense<0.000000e+00> : vector<288x128xf32>
    %2 = tpu.matmul %0, %1, %cst {dimension_numbers = #tpu.dot_dimension_numbers<[1], [0], [0], [1], [0, 0, 1, 1], [], []>} : vector<288x256xbf16>, vector<256x128xbf16>, vector<288x128xf32> -> vector<288x128xf32>
    %c0_3 = arith.constant 0 : index
    %c0_4 = arith.constant 0 : index
    %3 = vector.load %arg3[%c0_3, %c0_4] : memref<1x128xf32, #tpu.memory_space<vmem>>, vector<1x128xf32>
    %4 = vector.broadcast %3 : vector<1x128xf32> to vector<288x128xf32>
    %5 = arith.addf %2, %4 : vector<288x128xf32>
    %cst_5 = arith.constant 0.000000e+00 : f32
    %6 = vector.broadcast %cst_5 : f32 to vector<288x128xf32>
    %7 = arith.maximumf %5, %6 : vector<288x128xf32>
    %c0_6 = arith.constant 0 : index
    %c0_7 = arith.constant 0 : index
    %8 = vector.load %arg4[%c0_6, %c0_7] : memref<288x128xf32, #tpu.memory_space<vmem>>, vector<288x128xf32>
    tpu.vector_store %arg4[%c0_6, %c0_7], %7 {strides = array<i32>} : memref<288x128xf32, #tpu.memory_space<vmem>>, vector<288x128xf32>,
    return
  }
  func.func @transform_0(%arg0: i32) -> (i32, i32) {
    %c0_i32 = arith.constant 0 : i32
    %c0_i32_0 = arith.constant 0 : i32
    return %arg0, %c0_i32 : i32, i32
  }
  func.func @transform_1(%arg0: i32) -> (i32, i32) {
    %c0_i32 = arith.constant 0 : i32
    %c0_i32_0 = arith.constant 0 : i32
    %c0_i32_1 = arith.constant 0 : i32
    return %c0_i32, %c0_i32_0 : i32, i32
  }
  func.func @transform_2(%arg0: i32) -> (i32, i32) {
    %c0_i32 = arith.constant 0 : i32
    %c0_i32_0 = arith.constant 0 : i32
    %c0_i32_1 = arith.constant 0 : i32
    return %c0_i32, %c0_i32_0 : i32, i32
  }
  func.func @transform_3(%arg0: i32) -> (i32, i32) {
    %c0_i32 = arith.constant 0 : i32
    %c0_i32_0 = arith.constant 0 : i32
    return %arg0, %c0_i32 : i32, i32
  }
}

module attributes {stable_mosaic.version = 11 : i64} {
  func.func @_matmul_bias_act_kernel(%arg0: i32, %arg1: memref<64x512xbf16, #tpu.memory_space<vmem>>, %arg2: memref<512x128xbf16, #tpu.memory_space<vmem>>, %arg3: memref<1x128xf32, #tpu.memory_space<vmem>>, %arg4: memref<64x128xf32, #tpu.memory_space<vmem>>) attributes {dimension_semantics = [#tpu.dimension_semantics<parallel>], iteration_bounds = array<i64: 1>, scalar_prefetch = 0 : i64, scratch_operands = 0 : i64, tpu.core_type = #tpu.core_type<tc>, window_params = [{transform_indices = @transform_0, window_bounds = array<i64: 64, 512>}, {pipeline_mode = #tpu.pipeline_mode<synchronous>, transform_indices = @transform_1, window_bounds = array<i64: 512, 128>}, {pipeline_mode = #tpu.pipeline_mode<synchronous>, transform_indices = @transform_2, window_bounds = array<i64: 1, 128>}, {transform_indices = @transform_3, window_bounds = array<i64: 64, 128>}]} {
    %c0 = arith.constant 0 : index
    %c0_0 = arith.constant 0 : index
    %0 = vector.load %arg1[%c0, %c0_0] : memref<64x512xbf16, #tpu.memory_space<vmem>>, vector<64x512xbf16>
    %c0_1 = arith.constant 0 : index
    %c0_2 = arith.constant 0 : index
    %1 = vector.load %arg2[%c0_1, %c0_2] : memref<512x128xbf16, #tpu.memory_space<vmem>>, vector<512x128xbf16>
    %cst = arith.constant dense<0.000000e+00> : vector<64x128xf32>
    %2 = tpu.matmul %0, %1, %cst {dimension_numbers = #tpu.dot_dimension_numbers<[1], [0], [0], [1], [0, 0, 1, 1], [], []>} : vector<64x512xbf16>, vector<512x128xbf16>, vector<64x128xf32> -> vector<64x128xf32>
    %c0_3 = arith.constant 0 : index
    %c0_4 = arith.constant 0 : index
    %3 = vector.load %arg3[%c0_3, %c0_4] : memref<1x128xf32, #tpu.memory_space<vmem>>, vector<1x128xf32>
    %4 = vector.broadcast %3 : vector<1x128xf32> to vector<64x128xf32>
    %5 = arith.addf %2, %4 : vector<64x128xf32>
    %cst_5 = arith.constant 0.000000e+00 : f32
    %6 = vector.broadcast %cst_5 : f32 to vector<64x128xf32>
    %7 = arith.maximumf %5, %6 : vector<64x128xf32>
    %c0_6 = arith.constant 0 : index
    %c0_7 = arith.constant 0 : index
    %8 = vector.load %arg4[%c0_6, %c0_7] : memref<64x128xf32, #tpu.memory_space<vmem>>, vector<64x128xf32>
    tpu.vector_store %arg4[%c0_6, %c0_7], %7 {strides = array<i32>} : memref<64x128xf32, #tpu.memory_space<vmem>>, vector<64x128xf32>,
    return
  }
  func.func @transform_0(%arg0: i32) -> (i32, i32) {
    %c0_i32 = arith.constant 0 : i32
    %c0_i32_0 = arith.constant 0 : i32
    return %arg0, %c0_i32 : i32, i32
  }
  func.func @transform_1(%arg0: i32) -> (i32, i32) {
    %c0_i32 = arith.constant 0 : i32
    %c0_i32_0 = arith.constant 0 : i32
    %c0_i32_1 = arith.constant 0 : i32
    return %c0_i32, %c0_i32_0 : i32, i32
  }
  func.func @transform_2(%arg0: i32) -> (i32, i32) {
    %c0_i32 = arith.constant 0 : i32
    %c0_i32_0 = arith.constant 0 : i32
    %c0_i32_1 = arith.constant 0 : i32
    return %c0_i32, %c0_i32_0 : i32, i32
  }
  func.func @transform_3(%arg0: i32) -> (i32, i32) {
    %c0_i32 = arith.constant 0 : i32
    %c0_i32_0 = arith.constant 0 : i32
    return %arg0, %c0_i32 : i32, i32
  }
}

module attributes {stable_mosaic.version = 11 : i64} {
  func.func @_matmul_bias_act_kernel(%arg0: i32, %arg1: memref<32x640xbf16, #tpu.memory_space<vmem>>, %arg2: memref<640x128xbf16, #tpu.memory_space<vmem>>, %arg3: memref<1x128xf32, #tpu.memory_space<vmem>>, %arg4: memref<32x128xf32, #tpu.memory_space<vmem>>) attributes {dimension_semantics = [#tpu.dimension_semantics<parallel>], iteration_bounds = array<i64: 1>, scalar_prefetch = 0 : i64, scratch_operands = 0 : i64, tpu.core_type = #tpu.core_type<tc>, window_params = [{transform_indices = @transform_0, window_bounds = array<i64: 32, 640>}, {pipeline_mode = #tpu.pipeline_mode<synchronous>, transform_indices = @transform_1, window_bounds = array<i64: 640, 128>}, {pipeline_mode = #tpu.pipeline_mode<synchronous>, transform_indices = @transform_2, window_bounds = array<i64: 1, 128>}, {transform_indices = @transform_3, window_bounds = array<i64: 32, 128>}]} {
    %c0 = arith.constant 0 : index
    %c0_0 = arith.constant 0 : index
    %0 = vector.load %arg1[%c0, %c0_0] : memref<32x640xbf16, #tpu.memory_space<vmem>>, vector<32x640xbf16>
    %c0_1 = arith.constant 0 : index
    %c0_2 = arith.constant 0 : index
    %1 = vector.load %arg2[%c0_1, %c0_2] : memref<640x128xbf16, #tpu.memory_space<vmem>>, vector<640x128xbf16>
    %cst = arith.constant dense<0.000000e+00> : vector<32x128xf32>
    %2 = tpu.matmul %0, %1, %cst {dimension_numbers = #tpu.dot_dimension_numbers<[1], [0], [0], [1], [0, 0, 1, 1], [], []>} : vector<32x640xbf16>, vector<640x128xbf16>, vector<32x128xf32> -> vector<32x128xf32>
    %c0_3 = arith.constant 0 : index
    %c0_4 = arith.constant 0 : index
    %3 = vector.load %arg3[%c0_3, %c0_4] : memref<1x128xf32, #tpu.memory_space<vmem>>, vector<1x128xf32>
    %4 = vector.broadcast %3 : vector<1x128xf32> to vector<32x128xf32>
    %5 = arith.addf %2, %4 : vector<32x128xf32>
    %cst_5 = arith.constant 0.000000e+00 : f32
    %6 = vector.broadcast %cst_5 : f32 to vector<32x128xf32>
    %7 = arith.maximumf %5, %6 : vector<32x128xf32>
    %c0_6 = arith.constant 0 : index
    %c0_7 = arith.constant 0 : index
    %8 = vector.load %arg4[%c0_6, %c0_7] : memref<32x128xf32, #tpu.memory_space<vmem>>, vector<32x128xf32>
    tpu.vector_store %arg4[%c0_6, %c0_7], %7 {strides = array<i32>} : memref<32x128xf32, #tpu.memory_space<vmem>>, vector<32x128xf32>,
    return
  }
  func.func @transform_0(%arg0: i32) -> (i32, i32) {
    %c0_i32 = arith.constant 0 : i32
    %c0_i32_0 = arith.constant 0 : i32
    return %arg0, %c0_i32 : i32, i32
  }
  func.func @transform_1(%arg0: i32) -> (i32, i32) {
    %c0_i32 = arith.constant 0 : i32
    %c0_i32_0 = arith.constant 0 : i32
    %c0_i32_1 = arith.constant 0 : i32
    return %c0_i32, %c0_i32_0 : i32, i32
  }
  func.func @transform_2(%arg0: i32) -> (i32, i32) {
    %c0_i32 = arith.constant 0 : i32
    %c0_i32_0 = arith.constant 0 : i32
    %c0_i32_1 = arith.constant 0 : i32
    return %c0_i32, %c0_i32_0 : i32, i32
  }
  func.func @transform_3(%arg0: i32) -> (i32, i32) {
    %c0_i32 = arith.constant 0 : i32
    %c0_i32_0 = arith.constant 0 : i32
    return %arg0, %c0_i32 : i32, i32
  }
}

module attributes {stable_mosaic.version = 11 : i64} {
  func.func @_fc_head_kernel(%arg0: i32, %arg1: memref<16x640xbf16, #tpu.memory_space<vmem>>, %arg2: memref<640x512xbf16, #tpu.memory_space<vmem>>, %arg3: memref<1x512xf32, #tpu.memory_space<vmem>>, %arg4: memref<512x128xbf16, #tpu.memory_space<vmem>>, %arg5: memref<1x128xf32, #tpu.memory_space<vmem>>, %arg6: memref<16x128xf32, #tpu.memory_space<vmem>>, %arg7: memref<16x512xbf16, #tpu.memory_space<vmem>>) attributes {dimension_semantics = [#tpu.dimension_semantics<parallel>], iteration_bounds = array<i64: 1>, scalar_prefetch = 0 : i64, scratch_operands = 1 : i64, tpu.core_type = #tpu.core_type<tc>, window_params = [{transform_indices = @transform_0, window_bounds = array<i64: 16, 640>}, {pipeline_mode = #tpu.pipeline_mode<synchronous>, transform_indices = @transform_1, window_bounds = array<i64: 640, 512>}, {pipeline_mode = #tpu.pipeline_mode<synchronous>, transform_indices = @transform_2, window_bounds = array<i64: 1, 512>}, {pipeline_mode = #tpu.pipeline_mode<synchronous>, transform_indices = @transform_3, window_bounds = array<i64: 512, 128>}, {pipeline_mode = #tpu.pipeline_mode<synchronous>, transform_indices = @transform_4, window_bounds = array<i64: 1, 128>}, {transform_indices = @transform_5, window_bounds = array<i64: 16, 128>}]} {
    %c0 = arith.constant 0 : index
    %c0_0 = arith.constant 0 : index
    %0 = vector.load %arg1[%c0, %c0_0] : memref<16x640xbf16, #tpu.memory_space<vmem>>, vector<16x640xbf16>
    %c0_1 = arith.constant 0 : index
    %c0_2 = arith.constant 0 : index
    %1 = vector.load %arg2[%c0_1, %c0_2] : memref<640x512xbf16, #tpu.memory_space<vmem>>, vector<640x512xbf16>
    %cst = arith.constant dense<0.000000e+00> : vector<16x512xf32>
    %2 = tpu.matmul %0, %1, %cst {dimension_numbers = #tpu.dot_dimension_numbers<[1], [0], [0], [1], [0, 0, 1, 1], [], []>} : vector<16x640xbf16>, vector<640x512xbf16>, vector<16x512xf32> -> vector<16x512xf32>
    %c0_3 = arith.constant 0 : index
    %c0_4 = arith.constant 0 : index
    %3 = vector.load %arg3[%c0_3, %c0_4] : memref<1x512xf32, #tpu.memory_space<vmem>>, vector<1x512xf32>
    %4 = vector.broadcast %3 : vector<1x512xf32> to vector<16x512xf32>
    %5 = arith.addf %2, %4 : vector<16x512xf32>
    %cst_5 = arith.constant 0.000000e+00 : f32
    %6 = vector.broadcast %cst_5 : f32 to vector<16x512xf32>
    %7 = arith.maximumf %5, %6 : vector<16x512xf32>
    %8 = arith.truncf %7 : vector<16x512xf32> to vector<16x512xbf16>
    %c0_6 = arith.constant 0 : index
    %c0_7 = arith.constant 0 : index
    %9 = vector.load %arg7[%c0_6, %c0_7] : memref<16x512xbf16, #tpu.memory_space<vmem>>, vector<16x512xbf16>
    tpu.vector_store %arg7[%c0_6, %c0_7], %8 {strides = array<i32>} : memref<16x512xbf16, #tpu.memory_space<vmem>>, vector<16x512xbf16>,
    %c0_8 = arith.constant 0 : index
    %c0_9 = arith.constant 0 : index
    %10 = vector.load %arg7[%c0_8, %c0_9] : memref<16x512xbf16, #tpu.memory_space<vmem>>, vector<16x512xbf16>
    %c0_10 = arith.constant 0 : index
    %c0_11 = arith.constant 0 : index
    %11 = vector.load %arg4[%c0_10, %c0_11] : memref<512x128xbf16, #tpu.memory_space<vmem>>, vector<512x128xbf16>
    %cst_12 = arith.constant dense<0.000000e+00> : vector<16x128xf32>
    %12 = tpu.matmul %10, %11, %cst_12 {dimension_numbers = #tpu.dot_dimension_numbers<[1], [0], [0], [1], [0, 0, 1, 1], [], []>} : vector<16x512xbf16>, vector<512x128xbf16>, vector<16x128xf32> -> vector<16x128xf32>
    %c0_13 = arith.constant 0 : index
    %c0_14 = arith.constant 0 : index
    %13 = vector.load %arg5[%c0_13, %c0_14] : memref<1x128xf32, #tpu.memory_space<vmem>>, vector<1x128xf32>
    %14 = vector.broadcast %13 : vector<1x128xf32> to vector<16x128xf32>
    %15 = arith.addf %12, %14 : vector<16x128xf32>
    %c0_15 = arith.constant 0 : index
    %c0_16 = arith.constant 0 : index
    %16 = vector.load %arg6[%c0_15, %c0_16] : memref<16x128xf32, #tpu.memory_space<vmem>>, vector<16x128xf32>
    tpu.vector_store %arg6[%c0_15, %c0_16], %15 {strides = array<i32>} : memref<16x128xf32, #tpu.memory_space<vmem>>, vector<16x128xf32>,
    return
  }
  func.func @transform_0(%arg0: i32) -> (i32, i32) {
    %c0_i32 = arith.constant 0 : i32
    %c0_i32_0 = arith.constant 0 : i32
    return %arg0, %c0_i32 : i32, i32
  }
  func.func @transform_1(%arg0: i32) -> (i32, i32) {
    %c0_i32 = arith.constant 0 : i32
    %c0_i32_0 = arith.constant 0 : i32
    %c0_i32_1 = arith.constant 0 : i32
    return %c0_i32, %c0_i32_0 : i32, i32
  }
  func.func @transform_2(%arg0: i32) -> (i32, i32) {
    %c0_i32 = arith.constant 0 : i32
    %c0_i32_0 = arith.constant 0 : i32
    %c0_i32_1 = arith.constant 0 : i32
    return %c0_i32, %c0_i32_0 : i32, i32
  }
  func.func @transform_3(%arg0: i32) -> (i32, i32) {
    %c0_i32 = arith.constant 0 : i32
    %c0_i32_0 = arith.constant 0 : i32
    %c0_i32_1 = arith.constant 0 : i32
    return %c0_i32, %c0_i32_0 : i32, i32
  }
  func.func @transform_4(%arg0: i32) -> (i32, i32) {
    %c0_i32 = arith.constant 0 : i32
    %c0_i32_0 = arith.constant 0 : i32
    %c0_i32_1 = arith.constant 0 : i32
    return %c0_i32, %c0_i32_0 : i32, i32
  }
  func.func @transform_5(%arg0: i32) -> (i32, i32) {
    %c0_i32 = arith.constant 0 : i32
    %c0_i32_0 = arith.constant 0 : i32
    return %arg0, %c0_i32 : i32, i32
  }
}

</mosaic_0001>

<bundles_post_ra>
// kernel: dqn_forward.4
= control target key start
LH: loop header
LB: loop body
LE: loop exit
PB: predicated region body
PF: predicated region fallthrough
CT: control target
= control target key end

     0   :  { %v775_v0 = vmov 0   ;;  %s1133_s1 = inlined_call_operand.vmem [shape: bf16[256,128], index: 1, kind: input, shape index: {}]   ;;  %s1134_s0 = inlined_call_operand.vmem [shape: bf16[288,256], index: 0, kind: input, shape index: {}]   ;;  %s1135_s2 = inlined_call_operand.vmem [shape: f32[1,128], index: 2, kind: input, shape index: {}]   ;;  %s1136_s3 = inlined_call_operand.vmem [shape: f32[288,128], index: 3, kind: output, shape index: {}]  }
   0x1   :  { %366 = vmatprep.subr.bf16.mxu0 %v775_v0  ;;  %672 = vmatprep.subr.bf16.mxu1 %v775_v0  ;;  %v705_v1 = vld [vmem:[%s1133_s1 + $0x38] sm:$0xff]   ;;  %v706_v2 = vld [vmem:[%s1133_s1 + $0x30] sm:$0xff]   ;;  %v707_v3 = vld [vmem:[%s1133_s1 + $0x28] sm:$0xff]  }
   0x2   :  { %367 = vmatpush1.bf16.msra.mxu0 %v705_v1  ;;  %688 = vmatpush1.bf16.msra.mxu1 %v705_v1  ;;  %v708_v4 = vld [vmem:[%s1133_s1 + $0x20] sm:$0xff]   ;;  %v709_v5 = vld [vmem:[%s1133_s1 + $0x18] sm:$0xff]   ;;  %v710_v7 = vld [vmem:[%s1133_s1 + $0x10] sm:$0xff]  }
   0x3   :  { %368 = vmatprep.subr.bf16.mxu0 %v775_v0  ;;  %673 = vmatprep.subr.bf16.mxu1 %v775_v0  ;;  %v723_v6 = vld [vmem:[%s1134_s0 + $0x4] ss:$8 sps:$4 sm:$0xff]   ;;  %v726_v8 = vld [vmem:[%s1134_s0 + $0x94] ss:$8 sps:$4 sm:$0xff]   ;;  %v721_v19 = vld [vmem:[%s1134_s0] ss:$8 sps:$4 sm:$0xff]  }
   0x4   :  { %398 = vmatprep.mubr.bf16.mxu0 %v723_v6  ;;  %470 = vmatprep.mubr.bf16.mxu1 %v726_v8  ;;  %v711_v9 = vld [vmem:[%s1133_s1 + $0x8] sm:$0xff]   ;;  %v712_v10 = vld [vmem:[%s1133_s1] sm:$0xff]   ;;  %v713_v11 = vld [vmem:[%s1133_s1 + $0x78] sm:$0xff]  }
   0x5   :  { %v714_v12 = vld [vmem:[%s1133_s1 + $0x70] sm:$0xff]   ;;  %v715_v13 = vld [vmem:[%s1133_s1 + $0x68] sm:$0xff]   ;;  %v716_v14 = vld [vmem:[%s1133_s1 + $0x60] sm:$0xff]  }
   0x6   :  { %369 = vmatpush1.bf16.msra.mxu0 %v706_v2  ;;  %689 = vmatpush1.bf16.msra.mxu1 %v706_v2  ;;  %v717_v15 = vld [vmem:[%s1133_s1 + $0x58] sm:$0xff]   ;;  %v718_v16 = vld [vmem:[%s1133_s1 + $0x50] sm:$0xff]   ;;  %v719_v17 = vld [vmem:[%s1133_s1 + $0x48] sm:$0xff]  }
   0x7   :  { %370 = vmatprep.subr.bf16.mxu0 %v775_v0  ;;  %674 = vmatprep.subr.bf16.mxu1 %v775_v0  ;;  %v720_v18 = vld [vmem:[%s1133_s1 + $0x40] sm:$0xff]   ;;  %v724_v20 = vld [vmem:[%s1134_s0 + $0x90] ss:$8 sps:$4 sm:$0xff]   ;;  %v727_v21 = vld [vmem:[%s1134_s0 + $0x14] ss:$8 sps:$4 sm:$0xff]  }
   0x8   :  { %v729_v22 = vld [vmem:[%s1134_s0 + $0xa4] ss:$8 sps:$4 sm:$0xff]   ;;  %v731_v23 = vld [vmem:[%s1134_s0 + $0x10] ss:$8 sps:$4 sm:$0xff]   ;;  %v732_v24 = vld [vmem:[%s1134_s0 + $0xa0] ss:$8 sps:$4 sm:$0xff]  }
   0x9   :  { %v733_v25 = vld [vmem:[%s1134_s0 + $0x24] ss:$8 sps:$4 sm:$0xff]   ;;  %v735_v26 = vld [vmem:[%s1134_s0 + $0xb4] ss:$8 sps:$4 sm:$0xff]   ;;  %v737_v27 = vld [vmem:[%s1134_s0 + $0x20] ss:$8 sps:$4 sm:$0xff]  }
   0xa   :  { %371 = vmatpush1.bf16.msra.mxu0 %v707_v3  ;;  %690 = vmatpush1.bf16.msra.mxu1 %v707_v3  ;;  %v738_v28 = vld [vmem:[%s1134_s0 + $0xb0] ss:$8 sps:$4 sm:$0xff]   ;;  %v739_v29 = vld [vmem:[%s1134_s0 + $0x34] ss:$8 sps:$4 sm:$0xff]   ;;  %v741_v30 = vld [vmem:[%s1134_s0 + $0xc4] ss:$8 sps:$4 sm:$0xff]  }
   0xb   :  { %372 = vmatprep.subr.bf16.mxu0 %v775_v0  ;;  %675 = vmatprep.subr.bf16.mxu1 %v775_v0  ;;  %v743_v31 = vld [vmem:[%s1134_s0 + $0x30] ss:$8 sps:$4 sm:$0xff]   ;;  %v744_v32 = vld [vmem:[%s1134_s0 + $0xc0] ss:$8 sps:$4 sm:$0xff]   ;;  %v745_v33 = vld [vmem:[%s1134_s0 + $0x44] ss:$8 sps:$4 sm:$0xff]  }
   0xc   :  { %v747_v34 = vld [vmem:[%s1134_s0 + $0xd4] ss:$8 sps:$4 sm:$0xff]   ;;  %v749_v35 = vld [vmem:[%s1134_s0 + $0x40] ss:$8 sps:$4 sm:$0xff]   ;;  %v750_v36 = vld [vmem:[%s1134_s0 + $0xd0] ss:$8 sps:$4 sm:$0xff]  }
   0xd   :  { %v751_v37 = vld [vmem:[%s1134_s0 + $0x54] ss:$8 sps:$4 sm:$0xff]   ;;  %v753_v38 = vld [vmem:[%s1134_s0 + $0xe4] ss:$8 sps:$4 sm:$0xff]   ;;  %v755_v39 = vld [vmem:[%s1134_s0 + $0x50] ss:$8 sps:$4 sm:$0xff]  }
   0xe   :  { %373 = vmatpush1.bf16.msra.mxu0 %v708_v4  ;;  %691 = vmatpush1.bf16.msra.mxu1 %v708_v4  ;;  %v756_v40 = vld [vmem:[%s1134_s0 + $0xe0] ss:$8 sps:$4 sm:$0xff]   ;;  %v757_v41 = vld [vmem:[%s1134_s0 + $0x64] ss:$8 sps:$4 sm:$0xff]   ;;  %v759_v42 = vld [vmem:[%s1134_s0 + $0xf4] ss:$8 sps:$4 sm:$0xff]  }
   0xf   :  { %374 = vmatprep.subr.bf16.mxu0 %v775_v0  ;;  %676 = vmatprep.subr.bf16.mxu1 %v775_v0  ;;  %v761_v43 = vld [vmem:[%s1134_s0 + $0x60] ss:$8 sps:$4 sm:$0xff]   ;;  %v762_v44 = vld [vmem:[%s1134_s0 + $0xf0] ss:$8 sps:$4 sm:$0xff]   ;;  %v763_v45 = vld [vmem:[%s1134_s0 + $0x74] ss:$8 sps:$4 sm:$0xff]  }
  0x10   :  { %v765_v46 = vld [vmem:[%s1134_s0 + $0x104] ss:$8 sps:$4 sm:$0xff]   ;;  %v767_v47 = vld [vmem:[%s1134_s0 + $0x70] ss:$8 sps:$4 sm:$0xff]   ;;  %v768_v48 = vld [vmem:[%s1134_s0 + $0x100] ss:$8 sps:$4 sm:$0xff]  }
  0x11   :  { %v769_v49 = vld [vmem:[%s1134_s0 + $0x84] ss:$8 sps:$4 sm:$0xff]   ;;  %v771_v50 = vld [vmem:[%s1134_s0 + $0x114] ss:$8 sps:$4 sm:$0xff]   ;;  %v773_v51 = vld [vmem:[%s1134_s0 + $0x80] ss:$8 sps:$4 sm:$0xff]  }
  0x12   :  { %375 = vmatpush1.bf16.msra.mxu0 %v709_v5  ;;  %692 = vmatpush1.bf16.msra.mxu1 %v709_v5  ;;  %v774_v52 = vld [vmem:[%s1134_s0 + $0x110] ss:$8 sps:$4 sm:$0xff]   ;;  %v987_v53 = vld [vmem:[%s1135_s2] ss:$0 sm:$0xff] }
  0x13   :  { %376 = vmatprep.subr.bf16.mxu0 %v775_v0  ;;  %677 = vmatprep.subr.bf16.mxu1 %v775_v0 }
  0x16   :  { %377 = vmatpush1.bf16.msra.mxu0 %v710_v7  ;;  %693 = vmatpush1.bf16.msra.mxu1 %v710_v7 }
  0x17   :  { %378 = vmatprep.subr.bf16.mxu0 %v775_v0  ;;  %678 = vmatprep.subr.bf16.mxu1 %v775_v0 }
  0x1a   :  { %379 = vmatpush1.bf16.msra.mxu0 %v711_v9  ;;  %694 = vmatpush1.bf16.msra.mxu1 %v711_v9 }
  0x1b   :  { %380 = vmatprep.subr.bf16.mxu0 %v775_v0  ;;  %679 = vmatprep.subr.bf16.mxu1 %v775_v0 }
  0x1e   :  { %381 = vmatpush1.bf16.msra.mxu0 %v712_v10  ;;  %695 = vmatpush1.bf16.msra.mxu1 %v712_v10 }
  0x1f   :  { %382 = vmatprep.subr.bf16.mxu0 %v775_v0  ;;  %680 = vmatprep.subr.bf16.mxu1 %v775_v0 }
  0x22   :  { %383 = vmatpush2.bf16.msra.mxu0 %v713_v11  ;;  %696 = vmatpush2.bf16.msra.mxu1 %v713_v11 }
  0x23   :  { %384 = vmatprep.subr.bf16.mxu0 %v775_v0  ;;  %681 = vmatprep.subr.bf16.mxu1 %v775_v0 }
  0x26   :  { %385 = vmatpush2.bf16.msra.mxu0 %v714_v12  ;;  %697 = vmatpush2.bf16.msra.mxu1 %v714_v12 }
  0x27   :  { %386 = vmatprep.subr.bf16.mxu0 %v775_v0  ;;  %682 = vmatprep.subr.bf16.mxu1 %v775_v0 }
  0x2a   :  { %387 = vmatpush2.bf16.msra.mxu0 %v715_v13  ;;  %698 = vmatpush2.bf16.msra.mxu1 %v715_v13 }
  0x2b   :  { %388 = vmatprep.subr.bf16.mxu0 %v775_v0  ;;  %683 = vmatprep.subr.bf16.mxu1 %v775_v0 }
  0x2e   :  { %389 = vmatpush2.bf16.msra.mxu0 %v716_v14  ;;  %699 = vmatpush2.bf16.msra.mxu1 %v716_v14 }
  0x2f   :  { %390 = vmatprep.subr.bf16.mxu0 %v775_v0  ;;  %684 = vmatprep.subr.bf16.mxu1 %v775_v0 }
  0x32   :  { %391 = vmatpush2.bf16.msra.mxu0 %v717_v15  ;;  %700 = vmatpush2.bf16.msra.mxu1 %v717_v15 }
  0x33   :  { %392 = vmatprep.subr.bf16.mxu0 %v775_v0  ;;  %685 = vmatprep.subr.bf16.mxu1 %v775_v0 }
  0x36   :  { %393 = vmatpush2.bf16.msra.mxu0 %v718_v16  ;;  %701 = vmatpush2.bf16.msra.mxu1 %v718_v16 }
  0x37   :  { %394 = vmatprep.subr.bf16.mxu0 %v775_v0  ;;  %686 = vmatprep.subr.bf16.mxu1 %v775_v0 }
  0x3a   :  { %395 = vmatpush2.bf16.msra.mxu0 %v719_v17  ;;  %702 = vmatpush2.bf16.msra.mxu1 %v719_v17 }
  0x3b   :  { %396 = vmatprep.subr.bf16.mxu0 %v775_v0  ;;  %687 = vmatprep.subr.bf16.mxu1 %v775_v0 }
  0x3e   :  { %397 = vmatpush2.bf16.msra.mxu0 %v720_v18  ;;  %703 = vmatpush2.bf16.msra.mxu1 %v720_v18 }
  0x41   :  { %399 = vmatmul.mubr.bf16.vlgmr.msra.gmra.mxu0 %v721_v19  ;;  %471 = vmatmul.mubr.bf16.vlgmr.msra.gmra.mxu1 %v724_v20 }
  0x42   :  { %406 = vmatprep.mubr.bf16.mxu0 %v727_v21  ;;  %478 = vmatprep.mubr.bf16.mxu1 %v729_v22 }
  0x49   :  { %407 = vmatmul.mubr.bf16.gmra.mxu0 %v731_v23  ;;  %479 = vmatmul.mubr.bf16.gmra.mxu1 %v732_v24 }
  0x4a   :  { %414 = vmatprep.mubr.bf16.mxu0 %v733_v25  ;;  %486 = vmatprep.mubr.bf16.mxu1 %v735_v26 }
  0x51   :  { %415 = vmatmul.mubr.bf16.gmra.mxu0 %v737_v27  ;;  %487 = vmatmul.mubr.bf16.gmra.mxu1 %v738_v28 }
  0x52   :  { %422 = vmatprep.mubr.bf16.mxu0 %v739_v29  ;;  %494 = vmatprep.mubr.bf16.mxu1 %v741_v30 }
  0x59   :  { %423 = vmatmul.mubr.bf16.gmra.mxu0 %v743_v31  ;;  %495 = vmatmul.mubr.bf16.gmra.mxu1 %v744_v32 }
  0x5a   :  { %430 = vmatprep.mubr.bf16.mxu0 %v745_v33  ;;  %502 = vmatprep.mubr.bf16.mxu1 %v747_v34 }
  0x61   :  { %431 = vmatmul.mubr.bf16.gmra.mxu0 %v749_v35  ;;  %503 = vmatmul.mubr.bf16.gmra.mxu1 %v750_v36 }
  0x62   :  { %438 = vmatprep.mubr.bf16.mxu0 %v751_v37  ;;  %510 = vmatprep.mubr.bf16.mxu1 %v753_v38 }
  0x69   :  { %439 = vmatmul.mubr.bf16.gmra.mxu0 %v755_v39  ;;  %511 = vmatmul.mubr.bf16.gmra.mxu1 %v756_v40 }
  0x6a   :  { %446 = vmatprep.mubr.bf16.mxu0 %v757_v41  ;;  %518 = vmatprep.mubr.bf16.mxu1 %v759_v42 }
  0x71   :  { %447 = vmatmul.mubr.bf16.gmra.mxu0 %v761_v43  ;;  %519 = vmatmul.mubr.bf16.gmra.mxu1 %v762_v44 }
  0x72   :  { %454 = vmatprep.mubr.bf16.mxu0 %v763_v45  ;;  %526 = vmatprep.mubr.bf16.mxu1 %v765_v46 }
  0x79   :  { %455 = vmatmul.mubr.bf16.gmra.mxu0 %v767_v47  ;;  %527 = vmatmul.mubr.bf16.gmra.mxu1 %v768_v48 }
  0x7a   :  { %462 = vmatprep.mubr.bf16.mxu0 %v769_v49  ;;  %534 = vmatprep.mubr.bf16.mxu1 %v771_v50 }
  0x81   :  { %463 = vmatmul.mubr.bf16.gmra.mxu0 %v773_v51  ;;  %535 = vmatmul.mubr.bf16.gmra.mxu1 %v774_v52 }
 0x101   :  { %v400_v54 = vpop.f32.mrf.mxu0  ;;  %v472_v55 = vpop.f32.mrf.mxu1 }
 0x102   :  { %v401_v56 = vadd.f32 %v987_v53, %v400_v54  ;;  %v473_v57 = vadd.f32 %v987_v53, %v472_v55 }
 0x103   :  { %v402_v58 = vpop.f32.mrf.mxu0  ;;  %v474_v59 = vpop.f32.mrf.mxu1 }
 0x104   :  { %v543_v60 = vmax.f32 %v401_v56, 0.0  ;;  %v561_v61 = vmax.f32 %v473_v57, 0.0 }
 0x105   :  { %v403_v62 = vpop.f32.mrf.mxu0  ;;  %v475_v63 = vpop.f32.mrf.mxu1 }
 0x106   :  { %579 = vst [vmem:[%s1136_s3] sm:$0xff] %v543_v60  ;;  %597 = vst [vmem:[%s1136_s3 + $0x90] sm:$0xff] %v561_v61  ;;  %v404_v0 = vadd.f32 %v987_v53, %v403_v62  ;;  %v476_v1 = vadd.f32 %v987_v53, %v475_v63 }
 0x107   :  { %v405_v2 = vpop.f32.mrf.mxu0  ;;  %v477_v3 = vpop.f32.mrf.mxu1 }
 0x108   :  { %v544_v4 = vmax.f32 %v404_v0, 0.0  ;;  %v562_v5 = vmax.f32 %v476_v1, 0.0 }
 0x109   :  { %v408_v6 = vpop.f32.mrf.mxu0  ;;  %v480_v7 = vpop.f32.mrf.mxu1 }
 0x10a   :  { %580 = vst [vmem:[%s1136_s3 + $0x8] sm:$0xff] %v544_v4  ;;  %598 = vst [vmem:[%s1136_s3 + $0x98] sm:$0xff] %v562_v5  ;;  %v409_v8 = vadd.f32 %v987_v53, %v408_v6  ;;  %v481_v9 = vadd.f32 %v987_v53, %v480_v7 }
 0x10b   :  { %v410_v10 = vpop.f32.mrf.mxu0  ;;  %v482_v11 = vpop.f32.mrf.mxu1 }
 0x10c   :  { %v545_v12 = vmax.f32 %v409_v8, 0.0  ;;  %v563_v13 = vmax.f32 %v481_v9, 0.0 }
 0x10d   :  { %v411_v14 = vpop.f32.mrf.mxu0  ;;  %v483_v15 = vpop.f32.mrf.mxu1 }
 0x10e   :  { %581 = vst [vmem:[%s1136_s3 + $0x10] sm:$0xff] %v545_v12  ;;  %599 = vst [vmem:[%s1136_s3 + $0xa0] sm:$0xff] %v563_v13  ;;  %v412_v16 = vadd.f32 %v987_v53, %v411_v14  ;;  %v484_v17 = vadd.f32 %v987_v53, %v483_v15 }
 0x10f   :  { %v413_v18 = vpop.f32.mrf.mxu0  ;;  %v485_v19 = vpop.f32.mrf.mxu1 }
 0x110   :  { %v546_v20 = vmax.f32 %v412_v16, 0.0  ;;  %v564_v21 = vmax.f32 %v484_v17, 0.0 }
 0x111   :  { %v416_v22 = vpop.f32.mrf.mxu0  ;;  %v488_v23 = vpop.f32.mrf.mxu1 }
 0x112   :  { %582 = vst [vmem:[%s1136_s3 + $0x18] sm:$0xff] %v546_v20  ;;  %600 = vst [vmem:[%s1136_s3 + $0xa8] sm:$0xff] %v564_v21  ;;  %v417_v24 = vadd.f32 %v987_v53, %v416_v22  ;;  %v489_v25 = vadd.f32 %v987_v53, %v488_v23 }
 0x113   :  { %v418_v26 = vpop.f32.mrf.mxu0  ;;  %v490_v27 = vpop.f32.mrf.mxu1 }
 0x114   :  { %v547_v28 = vmax.f32 %v417_v24, 0.0  ;;  %v565_v29 = vmax.f32 %v489_v25, 0.0 }
 0x115   :  { %v419_v30 = vpop.f32.mrf.mxu0  ;;  %v491_v31 = vpop.f32.mrf.mxu1 }
 0x116   :  { %583 = vst [vmem:[%s1136_s3 + $0x20] sm:$0xff] %v547_v28  ;;  %601 = vst [vmem:[%s1136_s3 + $0xb0] sm:$0xff] %v565_v29  ;;  %v420_v32 = vadd.f32 %v987_v53, %v419_v30  ;;  %v492_v33 = vadd.f32 %v987_v53, %v491_v31 }
 0x117   :  { %v421_v34 = vpop.f32.mrf.mxu0  ;;  %v493_v35 = vpop.f32.mrf.mxu1 }
 0x118   :  { %v548_v36 = vmax.f32 %v420_v32, 0.0  ;;  %v566_v37 = vmax.f32 %v492_v33, 0.0 }
 0x119   :  { %v424_v38 = vpop.f32.mrf.mxu0  ;;  %v496_v39 = vpop.f32.mrf.mxu1 }
 0x11a   :  { %584 = vst [vmem:[%s1136_s3 + $0x28] sm:$0xff] %v548_v36  ;;  %602 = vst [vmem:[%s1136_s3 + $0xb8] sm:$0xff] %v566_v37  ;;  %v425_v40 = vadd.f32 %v987_v53, %v424_v38  ;;  %v497_v41 = vadd.f32 %v987_v53, %v496_v39 }
 0x11b   :  { %v426_v42 = vpop.f32.mrf.mxu0  ;;  %v498_v43 = vpop.f32.mrf.mxu1 }
 0x11c   :  { %v549_v44 = vmax.f32 %v425_v40, 0.0  ;;  %v567_v45 = vmax.f32 %v497_v41, 0.0 }
 0x11d   :  { %v427_v46 = vpop.f32.mrf.mxu0  ;;  %v499_v47 = vpop.f32.mrf.mxu1 }
 0x11e   :  { %585 = vst [vmem:[%s1136_s3 + $0x30] sm:$0xff] %v549_v44  ;;  %603 = vst [vmem:[%s1136_s3 + $0xc0] sm:$0xff] %v567_v45  ;;  %v428_v48 = vadd.f32 %v987_v53, %v427_v46  ;;  %v500_v49 = vadd.f32 %v987_v53, %v499_v47 }
 0x11f   :  { %v429_v50 = vpop.f32.mrf.mxu0  ;;  %v501_v51 = vpop.f32.mrf.mxu1 }
 0x120   :  { %v550_v52 = vmax.f32 %v428_v48, 0.0  ;;  %v568_v54 = vmax.f32 %v500_v49, 0.0 }
 0x121   :  { %v432_v55 = vpop.f32.mrf.mxu0  ;;  %v504_v56 = vpop.f32.mrf.mxu1 }
 0x122   :  { %586 = vst [vmem:[%s1136_s3 + $0x38] sm:$0xff] %v550_v52  ;;  %604 = vst [vmem:[%s1136_s3 + $0xc8] sm:$0xff] %v568_v54  ;;  %v433_v57 = vadd.f32 %v987_v53, %v432_v55  ;;  %v505_v58 = vadd.f32 %v987_v53, %v504_v56 }
 0x123   :  { %v434_v59 = vpop.f32.mrf.mxu0  ;;  %v506_v60 = vpop.f32.mrf.mxu1 }
 0x124   :  { %v551_v61 = vmax.f32 %v433_v57, 0.0  ;;  %v569_v62 = vmax.f32 %v505_v58, 0.0 }
 0x125   :  { %v435_v63 = vpop.f32.mrf.mxu0  ;;  %v507_v0 = vpop.f32.mrf.mxu1 }
 0x126   :  { %587 = vst [vmem:[%s1136_s3 + $0x40] sm:$0xff] %v551_v61  ;;  %605 = vst [vmem:[%s1136_s3 + $0xd0] sm:$0xff] %v569_v62  ;;  %v436_v1 = vadd.f32 %v987_v53, %v435_v63  ;;  %v508_v2 = vadd.f32 %v987_v53, %v507_v0 }
 0x127   :  { %v437_v3 = vpop.f32.mrf.mxu0  ;;  %v509_v4 = vpop.f32.mrf.mxu1 }
 0x128   :  { %v552_v5 = vmax.f32 %v436_v1, 0.0  ;;  %v570_v6 = vmax.f32 %v508_v2, 0.0 }
 0x129   :  { %v440_v7 = vpop.f32.mrf.mxu0  ;;  %v512_v8 = vpop.f32.mrf.mxu1 }
 0x12a   :  { %588 = vst [vmem:[%s1136_s3 + $0x48] sm:$0xff] %v552_v5  ;;  %606 = vst [vmem:[%s1136_s3 + $0xd8] sm:$0xff] %v570_v6  ;;  %v441_v9 = vadd.f32 %v987_v53, %v440_v7  ;;  %v513_v10 = vadd.f32 %v987_v53, %v512_v8 }
 0x12b   :  { %v442_v11 = vpop.f32.mrf.mxu0  ;;  %v514_v12 = vpop.f32.mrf.mxu1 }
 0x12c   :  { %v553_v13 = vmax.f32 %v441_v9, 0.0  ;;  %v571_v14 = vmax.f32 %v513_v10, 0.0 }
 0x12d   :  { %v443_v15 = vpop.f32.mrf.mxu0  ;;  %v515_v16 = vpop.f32.mrf.mxu1 }
 0x12e   :  { %589 = vst [vmem:[%s1136_s3 + $0x50] sm:$0xff] %v553_v13  ;;  %607 = vst [vmem:[%s1136_s3 + $0xe0] sm:$0xff] %v571_v14  ;;  %v444_v17 = vadd.f32 %v987_v53, %v443_v15  ;;  %v516_v18 = vadd.f32 %v987_v53, %v515_v16 }
 0x12f   :  { %v445_v19 = vpop.f32.mrf.mxu0  ;;  %v517_v20 = vpop.f32.mrf.mxu1 }
 0x130   :  { %v554_v21 = vmax.f32 %v444_v17, 0.0  ;;  %v572_v22 = vmax.f32 %v516_v18, 0.0 }
 0x131   :  { %v448_v23 = vpop.f32.mrf.mxu0  ;;  %v520_v24 = vpop.f32.mrf.mxu1 }
 0x132   :  { %590 = vst [vmem:[%s1136_s3 + $0x58] sm:$0xff] %v554_v21  ;;  %608 = vst [vmem:[%s1136_s3 + $0xe8] sm:$0xff] %v572_v22  ;;  %v449_v25 = vadd.f32 %v987_v53, %v448_v23  ;;  %v521_v26 = vadd.f32 %v987_v53, %v520_v24 }
 0x133   :  { %v450_v27 = vpop.f32.mrf.mxu0  ;;  %v522_v28 = vpop.f32.mrf.mxu1 }
 0x134   :  { %v555_v29 = vmax.f32 %v449_v25, 0.0  ;;  %v573_v30 = vmax.f32 %v521_v26, 0.0 }
 0x135   :  { %v451_v31 = vpop.f32.mrf.mxu0  ;;  %v523_v32 = vpop.f32.mrf.mxu1 }
 0x136   :  { %591 = vst [vmem:[%s1136_s3 + $0x60] sm:$0xff] %v555_v29  ;;  %609 = vst [vmem:[%s1136_s3 + $0xf0] sm:$0xff] %v573_v30  ;;  %v452_v33 = vadd.f32 %v987_v53, %v451_v31  ;;  %v524_v34 = vadd.f32 %v987_v53, %v523_v32 }
 0x137   :  { %v453_v35 = vpop.f32.mrf.mxu0  ;;  %v525_v36 = vpop.f32.mrf.mxu1 }
 0x138   :  { %v556_v37 = vmax.f32 %v452_v33, 0.0  ;;  %v574_v38 = vmax.f32 %v524_v34, 0.0 }
 0x139   :  { %v456_v39 = vpop.f32.mrf.mxu0  ;;  %v528_v40 = vpop.f32.mrf.mxu1 }
 0x13a   :  { %592 = vst [vmem:[%s1136_s3 + $0x68] sm:$0xff] %v556_v37  ;;  %610 = vst [vmem:[%s1136_s3 + $0xf8] sm:$0xff] %v574_v38  ;;  %v457_v41 = vadd.f32 %v987_v53, %v456_v39  ;;  %v529_v42 = vadd.f32 %v987_v53, %v528_v40 }
 0x13b   :  { %v458_v43 = vpop.f32.mrf.mxu0  ;;  %v530_v44 = vpop.f32.mrf.mxu1 }
 0x13c   :  { %v557_v45 = vmax.f32 %v457_v41, 0.0  ;;  %v575_v46 = vmax.f32 %v529_v42, 0.0 }
 0x13d   :  { %v459_v47 = vpop.f32.mrf.mxu0  ;;  %v531_v48 = vpop.f32.mrf.mxu1 }
 0x13e   :  { %593 = vst [vmem:[%s1136_s3 + $0x70] sm:$0xff] %v557_v45  ;;  %611 = vst [vmem:[%s1136_s3 + $0x100] sm:$0xff] %v575_v46  ;;  %v460_v49 = vadd.f32 %v987_v53, %v459_v47  ;;  %v532_v50 = vadd.f32 %v987_v53, %v531_v48 }
 0x13f   :  { %v461_v51 = vpop.f32.mrf.mxu0  ;;  %v533_v52 = vpop.f32.mrf.mxu1 }
 0x140   :  { %v558_v54 = vmax.f32 %v460_v49, 0.0  ;;  %v576_v55 = vmax.f32 %v532_v50, 0.0 }
 0x141   :  { %v464_v56 = vpop.f32.mrf.mxu0  ;;  %v536_v57 = vpop.f32.mrf.mxu1 }
 0x142   :  { %594 = vst [vmem:[%s1136_s3 + $0x78] sm:$0xff] %v558_v54  ;;  %612 = vst [vmem:[%s1136_s3 + $0x108] sm:$0xff] %v576_v55  ;;  %v465_v58 = vadd.f32 %v987_v53, %v464_v56  ;;  %v537_v59 = vadd.f32 %v987_v53, %v536_v57 }
 0x143   :  { %v466_v60 = vpop.f32.mrf.mxu0  ;;  %v538_v61 = vpop.f32.mrf.mxu1 }
 0x144   :  { %v559_v62 = vmax.f32 %v465_v58, 0.0  ;;  %v577_v63 = vmax.f32 %v537_v59, 0.0 }
 0x145   :  { %v467_v0 = vpop.f32.mrf.mxu0  ;;  %v539_v1 = vpop.f32.mrf.mxu1 }
 0x146   :  { %595 = vst [vmem:[%s1136_s3 + $0x80] sm:$0xff] %v559_v62  ;;  %613 = vst [vmem:[%s1136_s3 + $0x110] sm:$0xff] %v577_v63  ;;  %v468_v2 = vadd.f32 %v987_v53, %v467_v0  ;;  %v540_v3 = vadd.f32 %v987_v53, %v539_v1 }
 0x147   :  { %v469_v4 = vpop.f32.mrf.mxu0  ;;  %v541_v5 = vpop.f32.mrf.mxu1 }
 0x148   :  { %v560_v6 = vmax.f32 %v468_v2, 0.0  ;;  %v578_v7 = vmax.f32 %v540_v3, 0.0 }
 0x14a   :  { %596 = vst [vmem:[%s1136_s3 + $0x88] sm:$0xff] %v560_v6  ;;  %614 = vst [vmem:[%s1136_s3 + $0x118] sm:$0xff] %v578_v7 }

// kernel: dqn_forward.5
= control target key start
LH: loop header
LB: loop body
LE: loop exit
PB: predicated region body
PF: predicated region fallthrough
CT: control target
= control target key end

     0   :  { %s910_s1 = inlined_call_operand.vmem [shape: bf16[512,128], index: 1, kind: input, shape index: {}]   ;;  %s911_s0 = inlined_call_operand.vmem [shape: bf16[64,512], index: 0, kind: input, shape index: {}]   ;;  %s912_s2 = inlined_call_operand.vmem [shape: f32[1,128], index: 2, kind: input, shape index: {}]   ;;  %s913_s3 = inlined_call_operand.vmem [shape: f32[64,128], index: 3, kind: output, shape index: {}]  }
   0x1   :  { %v653_v0 = vld [vmem:[%s910_s1 + $0x78] sm:$0xff]   ;;  %v657_v4 = vld [vmem:[%s910_s1 + $0x70] sm:$0xff]   ;;  %v661_v8 = vld [vmem:[%s910_s1 + $0x68] sm:$0xff]  }
   0x2   :  { %v654_v1 = vld [vmem:[%s910_s1 + $0xf8] sm:$0xff]   ;;  %573 = vmatprep.subr.bf16.mxu0 %v653_v0  ;;  %v658_v5 = vld [vmem:[%s910_s1 + $0xf0] sm:$0xff]   ;;  %v662_v9 = vld [vmem:[%s910_s1 + $0xe8] sm:$0xff]  }
   0x3   :  { %v655_v2 = vld [vmem:[%s910_s1 + $0x38] sm:$0xff]   ;;  %613 = vmatprep.subr.bf16.mxu1 %v654_v1  ;;  %v659_v6 = vld [vmem:[%s910_s1 + $0x30] sm:$0xff]   ;;  %v663_v10 = vld [vmem:[%s910_s1 + $0x28] sm:$0xff]  }
   0x4   :  { %v656_v3 = vld [vmem:[%s910_s1 + $0xb8] sm:$0xff]   ;;  %574 = vmatpush3.bf16.msra.mxu0 %v655_v2  ;;  %v660_v7 = vld [vmem:[%s910_s1 + $0xb0] sm:$0xff]   ;;  %v664_v11 = vld [vmem:[%s910_s1 + $0xa8] sm:$0xff]  }
   0x5   :  { %614 = vmatpush3.bf16.msra.mxu1 %v656_v3  ;;  %575 = vmatprep.subr.bf16.mxu0 %v657_v4  ;;  %v665_v12 = vld [vmem:[%s910_s1 + $0x60] sm:$0xff]   ;;  %v669_v16 = vld [vmem:[%s910_s1 + $0x58] sm:$0xff]   ;;  %v673_v20 = vld [vmem:[%s910_s1 + $0x50] sm:$0xff]  }
   0x6   :  { %615 = vmatprep.subr.bf16.mxu1 %v658_v5  ;;  %v666_v13 = vld [vmem:[%s910_s1 + $0xe0] sm:$0xff]   ;;  %v670_v17 = vld [vmem:[%s910_s1 + $0xd8] sm:$0xff]   ;;  %v674_v21 = vld [vmem:[%s910_s1 + $0xd0] sm:$0xff]  }
   0x7   :  { %v667_v14 = vld [vmem:[%s910_s1 + $0x20] sm:$0xff]   ;;  %v671_v18 = vld [vmem:[%s910_s1 + $0x18] sm:$0xff]   ;;  %v675_v22 = vld [vmem:[%s910_s1 + $0x10] sm:$0xff]  }
   0x8   :  { %576 = vmatpush3.bf16.msra.mxu0 %v659_v6  ;;  %v668_v15 = vld [vmem:[%s910_s1 + $0xa0] sm:$0xff]   ;;  %v672_v19 = vld [vmem:[%s910_s1 + $0x98] sm:$0xff]   ;;  %v676_v23 = vld [vmem:[%s910_s1 + $0x90] sm:$0xff]  }
   0x9   :  { %616 = vmatpush3.bf16.msra.mxu1 %v660_v7  ;;  %577 = vmatprep.subr.bf16.mxu0 %v661_v8  ;;  %v677_v24 = vld [vmem:[%s910_s1 + $0x48] sm:$0xff]   ;;  %v681_v28 = vld [vmem:[%s910_s1 + $0x40] sm:$0xff]  }
   0xa   :  { %617 = vmatprep.subr.bf16.mxu1 %v662_v9  ;;  %v678_v25 = vld [vmem:[%s910_s1 + $0xc8] sm:$0xff]   ;;  %v682_v29 = vld [vmem:[%s910_s1 + $0xc0] sm:$0xff]  }
   0xb   :  { %v679_v26 = vld [vmem:[%s910_s1 + $0x8] sm:$0xff]   ;;  %v683_v30 = vld [vmem:[%s910_s1] sm:$0xff]  }
   0xc   :  { %578 = vmatpush3.bf16.msra.mxu0 %v663_v10  ;;  %v680_v27 = vld [vmem:[%s910_s1 + $0x88] sm:$0xff]   ;;  %v684_v31 = vld [vmem:[%s910_s1 + $0x80] sm:$0xff]  }
   0xd   :  { %618 = vmatpush3.bf16.msra.mxu1 %v664_v11  ;;  %579 = vmatprep.subr.bf16.mxu0 %v665_v12  ;;  %v685_v32 = vld [vmem:[%s911_s0] ss:$16 sps:$4 sm:$0xff]   ;;  %v687_v33 = vld [vmem:[%s911_s0 + $0x4] ss:$16 sps:$4 sm:$0xff]   ;;  %v688_v34 = vld [vmem:[%s911_s0 + $0x8] ss:$16 sps:$4 sm:$0xff]  }
   0xe   :  { %619 = vmatprep.subr.bf16.mxu1 %v666_v13  ;;  %v690_v35 = vld [vmem:[%s911_s0 + $0xc] ss:$16 sps:$4 sm:$0xff]   ;;  %406 = vmatprep.mubr.bf16.mxu0 %v687_v33  ;;  %v691_v36 = vld [vmem:[%s911_s0 + $0x24] ss:$16 sps:$4 sm:$0xff]   ;;  %v695_v38 = vld [vmem:[%s911_s0 + $0x20] ss:$16 sps:$4 sm:$0xff]  }
   0xf   :  { %471 = vmatprep.mubr.bf16.mxu1 %v690_v35  ;;  %v693_v37 = vld [vmem:[%s911_s0 + $0x2c] ss:$16 sps:$4 sm:$0xff]   ;;  %v696_v39 = vld [vmem:[%s911_s0 + $0x28] ss:$16 sps:$4 sm:$0xff]   ;;  %v697_v40 = vld [vmem:[%s911_s0 + $0x44] ss:$16 sps:$4 sm:$0xff]  }
  0x10   :  { %580 = vmatpush3.bf16.msra.mxu0 %v667_v14  ;;  %v699_v41 = vld [vmem:[%s911_s0 + $0x4c] ss:$16 sps:$4 sm:$0xff]   ;;  %v701_v42 = vld [vmem:[%s911_s0 + $0x40] ss:$16 sps:$4 sm:$0xff]   ;;  %v702_v43 = vld [vmem:[%s911_s0 + $0x48] ss:$16 sps:$4 sm:$0xff]  }
  0x11   :  { %620 = vmatpush3.bf16.msra.mxu1 %v668_v15  ;;  %581 = vmatprep.subr.bf16.mxu0 %v669_v16  ;;  %v703_v44 = vld [vmem:[%s911_s0 + $0x64] ss:$16 sps:$4 sm:$0xff]   ;;  %v705_v45 = vld [vmem:[%s911_s0 + $0x6c] ss:$16 sps:$4 sm:$0xff]   ;;  %v707_v46 = vld [vmem:[%s911_s0 + $0x60] ss:$16 sps:$4 sm:$0xff]  }
  0x12   :  { %621 = vmatprep.subr.bf16.mxu1 %v670_v17  ;;  %v708_v47 = vld [vmem:[%s911_s0 + $0x68] ss:$16 sps:$4 sm:$0xff]   ;;  %v876_v50 = vld [vmem:[%s912_s2] ss:$0 sm:$0xff] }
  0x14   :  { %582 = vmatpush3.bf16.msra.mxu0 %v671_v18 }
  0x15   :  { %622 = vmatpush3.bf16.msra.mxu1 %v672_v19  ;;  %583 = vmatprep.subr.bf16.mxu0 %v673_v20 }
  0x16   :  { %623 = vmatprep.subr.bf16.mxu1 %v674_v21 }
  0x18   :  { %584 = vmatpush3.bf16.msra.mxu0 %v675_v22 }
  0x19   :  { %624 = vmatpush3.bf16.msra.mxu1 %v676_v23  ;;  %585 = vmatprep.subr.bf16.mxu0 %v677_v24 }
  0x1a   :  { %625 = vmatprep.subr.bf16.mxu1 %v678_v25 }
  0x1c   :  { %586 = vmatpush3.bf16.msra.mxu0 %v679_v26 }
  0x1d   :  { %626 = vmatpush3.bf16.msra.mxu1 %v680_v27  ;;  %587 = vmatprep.subr.bf16.mxu0 %v681_v28 }
  0x1e   :  { %627 = vmatprep.subr.bf16.mxu1 %v682_v29 }
  0x20   :  { %588 = vmatpush3.bf16.msra.mxu0 %v683_v30 }
  0x21   :  { %628 = vmatpush3.bf16.msra.mxu1 %v684_v31 }
  0x23   :  { %407 = vmatmul.mubr.bf16.vlgmr.msra.gmra.mxu0 %v685_v32 }
  0x24   :  { %472 = vmatmul.mubr.bf16.vlgmr.msra.gmra.mxu1 %v688_v34  ;;  %414 = vmatprep.mubr.bf16.mxu0 %v691_v36 }
  0x25   :  { %479 = vmatprep.mubr.bf16.mxu1 %v693_v37 }
  0x2b   :  { %415 = vmatmul.mubr.bf16.gmra.mxu0 %v695_v38 }
  0x2c   :  { %480 = vmatmul.mubr.bf16.gmra.mxu1 %v696_v39  ;;  %422 = vmatprep.mubr.bf16.mxu0 %v697_v40 }
  0x2d   :  { %487 = vmatprep.mubr.bf16.mxu1 %v699_v41 }
  0x33   :  { %423 = vmatmul.mubr.bf16.gmra.mxu0 %v701_v42 }
  0x34   :  { %488 = vmatmul.mubr.bf16.gmra.mxu1 %v702_v43  ;;  %430 = vmatprep.mubr.bf16.mxu0 %v703_v44 }
  0x35   :  { %495 = vmatprep.mubr.bf16.mxu1 %v705_v45 }
  0x3b   :  { %431 = vmatmul.mubr.bf16.gmra.mxu0 %v707_v46 }
  0x3c   :  { %496 = vmatmul.mubr.bf16.gmra.mxu1 %v708_v47 }
  0xe3   :  { %v589_v48 = vpop.f32.mrf.mxu0 }
  0xe4   :  { %v629_v49 = vpop.f32.mrf.mxu1 }
  0xe5   :  { %v590_v51 = vpop.f32.mrf.mxu0 }
  0xe6   :  { %v591_v52 = vadd.f32 %v590_v51, %v589_v48  ;;  %v630_v53 = vpop.f32.mrf.mxu1 }
  0xe7   :  { %v592_v54 = vpop.f32.mrf.mxu0  ;;  %v631_v56 = vadd.f32 %v630_v53, %v629_v49 }
  0xe8   :  { %v409_v55 = vadd.f32 %v591_v52, %v876_v50  ;;  %v632_v57 = vpop.f32.mrf.mxu1 }
  0xe9   :  { %v593_v58 = vpop.f32.mrf.mxu0 }
  0xea   :  { %v474_v59 = vadd.f32 %v631_v56, %v409_v55  ;;  %v594_v60 = vadd.f32 %v593_v58, %v592_v54  ;;  %v633_v61 = vpop.f32.mrf.mxu1 }
  0xeb   :  { %v595_v62 = vpop.f32.mrf.mxu0  ;;  %v634_v1 = vadd.f32 %v633_v61, %v632_v57 }
  0xec   :  { %v504_v63 = vmax.f32 %v474_v59, 0.0  ;;  %v412_v0 = vadd.f32 %v594_v60, %v876_v50  ;;  %v635_v2 = vpop.f32.mrf.mxu1 }
  0xed   :  { %v596_v3 = vpop.f32.mrf.mxu0 }
  0xee   :  { %512 = vst [vmem:[%s913_s3] sm:$0xff] %v504_v63  ;;  %v477_v4 = vadd.f32 %v634_v1, %v412_v0  ;;  %v597_v5 = vadd.f32 %v596_v3, %v595_v62  ;;  %v636_v6 = vpop.f32.mrf.mxu1 }
  0xef   :  { %v598_v7 = vpop.f32.mrf.mxu0  ;;  %v637_v10 = vadd.f32 %v636_v6, %v635_v2 }
  0xf0   :  { %v505_v8 = vmax.f32 %v477_v4, 0.0  ;;  %v417_v9 = vadd.f32 %v597_v5, %v876_v50  ;;  %v638_v11 = vpop.f32.mrf.mxu1 }
  0xf1   :  { %v599_v12 = vpop.f32.mrf.mxu0 }
  0xf2   :  { %513 = vst [vmem:[%s913_s3 + $0x8] sm:$0xff] %v505_v8  ;;  %v482_v13 = vadd.f32 %v637_v10, %v417_v9  ;;  %v600_v14 = vadd.f32 %v599_v12, %v598_v7  ;;  %v639_v15 = vpop.f32.mrf.mxu1 }
  0xf3   :  { %v601_v16 = vpop.f32.mrf.mxu0  ;;  %v640_v19 = vadd.f32 %v639_v15, %v638_v11 }
  0xf4   :  { %v506_v17 = vmax.f32 %v482_v13, 0.0  ;;  %v420_v18 = vadd.f32 %v600_v14, %v876_v50  ;;  %v641_v20 = vpop.f32.mrf.mxu1 }
  0xf5   :  { %v602_v21 = vpop.f32.mrf.mxu0 }
  0xf6   :  { %514 = vst [vmem:[%s913_s3 + $0x10] sm:$0xff] %v506_v17  ;;  %v485_v22 = vadd.f32 %v640_v19, %v420_v18  ;;  %v603_v23 = vadd.f32 %v602_v21, %v601_v16  ;;  %v642_v24 = vpop.f32.mrf.mxu1 }
  0xf7   :  { %v604_v25 = vpop.f32.mrf.mxu0  ;;  %v643_v28 = vadd.f32 %v642_v24, %v641_v20 }
  0xf8   :  { %v507_v26 = vmax.f32 %v485_v22, 0.0  ;;  %v425_v27 = vadd.f32 %v603_v23, %v876_v50  ;;  %v644_v29 = vpop.f32.mrf.mxu1 }
  0xf9   :  { %v605_v30 = vpop.f32.mrf.mxu0 }
  0xfa   :  { %515 = vst [vmem:[%s913_s3 + $0x18] sm:$0xff] %v507_v26  ;;  %v490_v31 = vadd.f32 %v643_v28, %v425_v27  ;;  %v606_v32 = vadd.f32 %v605_v30, %v604_v25  ;;  %v645_v33 = vpop.f32.mrf.mxu1 }
  0xfb   :  { %v607_v34 = vpop.f32.mrf.mxu0  ;;  %v646_v37 = vadd.f32 %v645_v33, %v644_v29 }
  0xfc   :  { %v508_v35 = vmax.f32 %v490_v31, 0.0  ;;  %v428_v36 = vadd.f32 %v606_v32, %v876_v50  ;;  %v647_v38 = vpop.f32.mrf.mxu1 }
  0xfd   :  { %v608_v39 = vpop.f32.mrf.mxu0 }
  0xfe   :  { %516 = vst [vmem:[%s913_s3 + $0x20] sm:$0xff] %v508_v35  ;;  %v493_v40 = vadd.f32 %v646_v37, %v428_v36  ;;  %v609_v41 = vadd.f32 %v608_v39, %v607_v34  ;;  %v648_v42 = vpop.f32.mrf.mxu1 }
  0xff   :  { %v610_v43 = vpop.f32.mrf.mxu0  ;;  %v649_v46 = vadd.f32 %v648_v42, %v647_v38 }
 0x100   :  { %v509_v44 = vmax.f32 %v493_v40, 0.0  ;;  %v433_v45 = vadd.f32 %v609_v41, %v876_v50  ;;  %v650_v47 = vpop.f32.mrf.mxu1 }
 0x101   :  { %v611_v48 = vpop.f32.mrf.mxu0 }
 0x102   :  { %517 = vst [vmem:[%s913_s3 + $0x28] sm:$0xff] %v509_v44  ;;  %v498_v49 = vadd.f32 %v649_v46, %v433_v45  ;;  %v612_v51 = vadd.f32 %v611_v48, %v610_v43  ;;  %v651_v52 = vpop.f32.mrf.mxu1 }
 0x103   :  { %v652_v55 = vadd.f32 %v651_v52, %v650_v47 }
 0x104   :  { %v510_v53 = vmax.f32 %v498_v49, 0.0  ;;  %v436_v54 = vadd.f32 %v612_v51, %v876_v50 }
 0x106   :  { %518 = vst [vmem:[%s913_s3 + $0x30] sm:$0xff] %v510_v53  ;;  %v501_v56 = vadd.f32 %v652_v55, %v436_v54 }
 0x108   :  { %v511_v57 = vmax.f32 %v501_v56, 0.0 }
 0x10a   :  { %519 = vst [vmem:[%s913_s3 + $0x38] sm:$0xff] %v511_v57 }

// kernel: dqn_forward.6
= control target key start
LH: loop header
LB: loop body
LE: loop exit
PB: predicated region body
PF: predicated region fallthrough
CT: control target
= control target key end

     0   :  { %s941_s1 = inlined_call_operand.vmem [shape: bf16[640,128], index: 1, kind: input, shape index: {}]   ;;  %s942_s0 = inlined_call_operand.vmem [shape: bf16[32,640], index: 0, kind: input, shape index: {}]   ;;  %s943_s2 = inlined_call_operand.vmem [shape: f32[1,128], index: 2, kind: input, shape index: {}]   ;;  %s944_s3 = inlined_call_operand.vmem [shape: f32[32,128], index: 3, kind: output, shape index: {}]  }
   0x1   :  { %v702_v0 = vld [vmem:[%s941_s1 + $0x78] sm:$0xff]   ;;  %v706_v4 = vld [vmem:[%s941_s1 + $0x70] sm:$0xff]   ;;  %v710_v8 = vld [vmem:[%s941_s1 + $0x68] sm:$0xff]  }
   0x2   :  { %v703_v1 = vld [vmem:[%s941_s1 + $0x38] sm:$0xff]   ;;  %616 = vmatprep.subr.bf16.mxu0 %v702_v0  ;;  %v707_v5 = vld [vmem:[%s941_s1 + $0x30] sm:$0xff]   ;;  %v711_v9 = vld [vmem:[%s941_s1 + $0x28] sm:$0xff]  }
   0x3   :  { %v704_v2 = vld [vmem:[%s941_s1 + $0xf8] sm:$0xff]   ;;  %617 = vmatpush3.bf16.msra.mxu0 %v703_v1  ;;  %v708_v6 = vld [vmem:[%s941_s1 + $0xf0] sm:$0xff]   ;;  %v712_v10 = vld [vmem:[%s941_s1 + $0xe8] sm:$0xff]  }
   0x4   :  { %v705_v3 = vld [vmem:[%s941_s1 + $0xb8] sm:$0xff]   ;;  %644 = vmatprep.subr.bf16.mxu1 %v704_v2  ;;  %618 = vmatprep.subr.bf16.mxu0 %v706_v4  ;;  %v709_v7 = vld [vmem:[%s941_s1 + $0xb0] sm:$0xff]   ;;  %v713_v11 = vld [vmem:[%s941_s1 + $0xa8] sm:$0xff]  }
   0x5   :  { %645 = vmatpush3.bf16.msra.mxu1 %v705_v3  ;;  %v714_v12 = vld [vmem:[%s941_s1 + $0x60] sm:$0xff]   ;;  %v718_v16 = vld [vmem:[%s941_s1 + $0x58] sm:$0xff]   ;;  %v722_v20 = vld [vmem:[%s941_s1 + $0x50] sm:$0xff]  }
   0x6   :  { %646 = vmatprep.subr.bf16.mxu1 %v708_v6  ;;  %v715_v13 = vld [vmem:[%s941_s1 + $0x20] sm:$0xff]   ;;  %v719_v17 = vld [vmem:[%s941_s1 + $0x18] sm:$0xff]   ;;  %v723_v21 = vld [vmem:[%s941_s1 + $0x10] sm:$0xff]  }
   0x7   :  { %619 = vmatpush3.bf16.msra.mxu0 %v707_v5  ;;  %v716_v14 = vld [vmem:[%s941_s1 + $0xe0] sm:$0xff]   ;;  %v720_v18 = vld [vmem:[%s941_s1 + $0xd8] sm:$0xff]   ;;  %v724_v22 = vld [vmem:[%s941_s1 + $0xd0] sm:$0xff]  }
   0x8   :  { %620 = vmatprep.subr.bf16.mxu0 %v710_v8  ;;  %v717_v15 = vld [vmem:[%s941_s1 + $0xa0] sm:$0xff]   ;;  %v721_v19 = vld [vmem:[%s941_s1 + $0x98] sm:$0xff]   ;;  %v725_v23 = vld [vmem:[%s941_s1 + $0x90] sm:$0xff]  }
   0x9   :  { %647 = vmatpush3.bf16.msra.mxu1 %v709_v7  ;;  %v726_v24 = vld [vmem:[%s941_s1 + $0x48] sm:$0xff]   ;;  %v730_v28 = vld [vmem:[%s941_s1 + $0x40] sm:$0xff]   ;;  %v737_v34 = vld [vmem:[%s941_s1 + $0x138] sm:$0xff]  }
   0xa   :  { %648 = vmatprep.subr.bf16.mxu1 %v712_v10  ;;  %v727_v25 = vld [vmem:[%s941_s1 + $0x8] sm:$0xff]   ;;  %v731_v29 = vld [vmem:[%s941_s1] sm:$0xff]   ;;  %v741_v37 = vld [vmem:[%s941_s1 + $0x130] sm:$0xff]  }
   0xb   :  { %621 = vmatpush3.bf16.msra.mxu0 %v711_v9  ;;  %v728_v26 = vld [vmem:[%s941_s1 + $0xc8] sm:$0xff]   ;;  %v732_v30 = vld [vmem:[%s941_s1 + $0xc0] sm:$0xff]   ;;  %v744_v44 = vld [vmem:[%s941_s1 + $0x118] sm:$0xff]  }
   0xc   :  { %622 = vmatprep.subr.bf16.mxu0 %v714_v12  ;;  %v729_v27 = vld [vmem:[%s941_s1 + $0x88] sm:$0xff]   ;;  %v733_v31 = vld [vmem:[%s942_s0] ss:$20 sps:$4 sm:$0xff]   ;;  %v735_v32 = vld [vmem:[%s942_s0 + $0x4] ss:$20 sps:$4 sm:$0xff]  }
   0xd   :  { %649 = vmatpush3.bf16.msra.mxu1 %v713_v11  ;;  %v736_v33 = vld [vmem:[%s941_s1 + $0x80] sm:$0xff]   ;;  %438 = vmatprep.mubr.bf16.mxu0 %v735_v32  ;;  %v738_v35 = vld [vmem:[%s942_s0 + $0x8] ss:$20 sps:$4 sm:$0xff]   ;;  %v751_v46 = vld [vmem:[%s941_s1 + $0x110] sm:$0xff]  }
   0xe   :  { %650 = vmatprep.subr.bf16.mxu1 %v716_v14  ;;  %v740_v36 = vld [vmem:[%s942_s0 + $0xc] ss:$20 sps:$4 sm:$0xff]   ;;  %v747_v41 = vld [vmem:[%s942_s0 + $0x28] ss:$20 sps:$4 sm:$0xff]   ;;  %v750_v43 = vld [vmem:[%s942_s0 + $0x30] ss:$20 sps:$4 sm:$0xff]  }
   0xf   :  { %623 = vmatpush3.bf16.msra.mxu0 %v715_v13  ;;  %487 = vmatprep.mubr.bf16.mxu1 %v740_v36  ;;  %v742_v38 = vld [vmem:[%s941_s1 + $0x128] sm:$0xff]   ;;  %v743_v39 = vld [vmem:[%s941_s1 + $0x120] sm:$0xff]  }
  0x10   :  { %624 = vmatprep.subr.bf16.mxu0 %v718_v16  ;;  %v745_v40 = vld [vmem:[%s942_s0 + $0x2c] ss:$20 sps:$4 sm:$0xff]   ;;  %v748_v42 = vld [vmem:[%s942_s0 + $0x34] ss:$20 sps:$4 sm:$0xff]   ;;  %v754_v45 = vld [vmem:[%s942_s0 + $0x10] ss:$20 sps:$4 sm:$0xff]  }
  0x11   :  { %651 = vmatpush3.bf16.msra.mxu1 %v717_v15  ;;  %v752_v47 = vld [vmem:[%s941_s1 + $0x108] sm:$0xff]   ;;  %v753_v48 = vld [vmem:[%s941_s1 + $0x100] sm:$0xff]  }
  0x12   :  { %652 = vmatprep.subr.bf16.mxu1 %v720_v18  ;;  %v755_v49 = vld [vmem:[%s942_s0 + $0x38] ss:$20 sps:$4 sm:$0xff]   ;;  %v565_v3 = vld [vmem:[%s943_s2] ss:$0 sm:$0xff] }
  0x13   :  { %625 = vmatpush3.bf16.msra.mxu0 %v719_v17 }
  0x14   :  { %626 = vmatprep.subr.bf16.mxu0 %v722_v20 }
  0x15   :  { %653 = vmatpush3.bf16.msra.mxu1 %v721_v19 }
  0x16   :  { %654 = vmatprep.subr.bf16.mxu1 %v724_v22 }
  0x17   :  { %627 = vmatpush3.bf16.msra.mxu0 %v723_v21 }
  0x18   :  { %628 = vmatprep.subr.bf16.mxu0 %v726_v24 }
  0x19   :  { %655 = vmatpush3.bf16.msra.mxu1 %v725_v23 }
  0x1a   :  { %656 = vmatprep.subr.bf16.mxu1 %v728_v26 }
  0x1b   :  { %629 = vmatpush3.bf16.msra.mxu0 %v727_v25 }
  0x1c   :  { %630 = vmatprep.subr.bf16.mxu0 %v730_v28 }
  0x1d   :  { %657 = vmatpush3.bf16.msra.mxu1 %v729_v27 }
  0x1e   :  { %658 = vmatprep.subr.bf16.mxu1 %v732_v30 }
  0x1f   :  { %631 = vmatpush3.bf16.msra.mxu0 %v731_v29 }
  0x20   :  { %682 = vmatprep.subr.bf16.mxu0 %v737_v34 }
  0x21   :  { %659 = vmatpush3.bf16.msra.mxu1 %v736_v33 }
  0x22   :  { %439 = vmatmul.mubr.bf16.vlgmr.msra.gmra.mxu0 %v733_v31 }
  0x23   :  { %683 = vmatpush3.bf16.msra.mxu0 %v737_v34  ;;  %446 = vmatprep.mubr.bf16.mxu0 %v745_v40 }
  0x24   :  { %488 = vmatmul.mubr.bf16.vlgmr.msra.gmra.mxu1 %v738_v35  ;;  %684 = vmatprep.subr.bf16.mxu0 %v741_v37 }
  0x25   :  { %495 = vmatprep.mubr.bf16.mxu1 %v748_v42 }
  0x27   :  { %685 = vmatpush3.bf16.msra.mxu0 %v741_v37 }
  0x28   :  { %686 = vmatprep.subr.bf16.mxu0 %v742_v38 }
  0x2a   :  { %447 = vmatmul.mubr.bf16.gmra.mxu0 %v747_v41 }
  0x2b   :  { %687 = vmatpush3.bf16.msra.mxu0 %v742_v38  ;;  %698 = vmatprep.mubr.bf16.mxu0 %v754_v45 }
  0x2c   :  { %688 = vmatprep.subr.bf16.mxu0 %v743_v39  ;;  %496 = vmatmul.mubr.bf16.gmra.mxu1 %v750_v43 }
  0x2f   :  { %689 = vmatpush3.bf16.msra.mxu0 %v743_v39 }
  0x30   :  { %690 = vmatprep.subr.bf16.mxu0 %v744_v44 }
  0x33   :  { %691 = vmatpush3.bf16.msra.mxu0 %v744_v44 }
  0x34   :  { %692 = vmatprep.subr.bf16.mxu0 %v751_v46 }
  0x37   :  { %693 = vmatpush3.bf16.msra.mxu0 %v751_v46 }
  0x38   :  { %694 = vmatprep.subr.bf16.mxu0 %v752_v47 }
  0x3b   :  { %695 = vmatpush3.bf16.msra.mxu0 %v752_v47 }
  0x3c   :  { %696 = vmatprep.subr.bf16.mxu0 %v753_v48 }
  0x3f   :  { %697 = vmatpush3.bf16.msra.mxu0 %v753_v48 }
  0x42   :  { %699 = vmatmul.mubr.bf16.vlgmr.msra.gmra.mxu0 %v755_v49 }
  0xe2   :  { %v632_v50 = vpop.f32.mrf.mxu0 }
  0xe4   :  { %v633_v51 = vpop.f32.mrf.mxu0  ;;  %v660_v52 = vpop.f32.mrf.mxu1 }
  0xe5   :  { %v634_v2 = vadd.f32 %v633_v51, %v632_v50 }
  0xe6   :  { %v635_v53 = vpop.f32.mrf.mxu0  ;;  %v661_v54 = vpop.f32.mrf.mxu1 }
  0xe7   :  { %v441_v8 = vadd.f32 %v634_v2, %v565_v3  ;;  %v662_v9 = vadd.f32 %v661_v54, %v660_v52 }
  0xe8   :  { %v636_v55 = vpop.f32.mrf.mxu0  ;;  %v663_v56 = vpop.f32.mrf.mxu1 }
  0xe9   :  { %v637_v10 = vadd.f32 %v636_v55, %v635_v53  ;;  %v490_v18 = vadd.f32 %v662_v9, %v441_v8 }
  0xea   :  { %v638_v57 = vpop.f32.mrf.mxu0  ;;  %v664_v58 = vpop.f32.mrf.mxu1 }
  0xeb   :  { %v444_v15 = vadd.f32 %v637_v10, %v565_v3  ;;  %v665_v16 = vadd.f32 %v664_v58, %v663_v56 }
  0xec   :  { %v639_v59 = vpop.f32.mrf.mxu0  ;;  %v666_v60 = vpop.f32.mrf.mxu1 }
  0xed   :  { %v640_v63 = vadd.f32 %v639_v59, %v638_v57  ;;  %v493_v26 = vadd.f32 %v665_v16, %v444_v15 }
  0xee   :  { %v641_v61 = vpop.f32.mrf.mxu0  ;;  %v667_v62 = vpop.f32.mrf.mxu1 }
  0xef   :  { %v449_v4 = vadd.f32 %v640_v63, %v565_v3  ;;  %v668_v5 = vadd.f32 %v667_v62, %v666_v60 }
  0xf0   :  { %v642_v0 = vpop.f32.mrf.mxu0  ;;  %v669_v1 = vpop.f32.mrf.mxu1 }
  0xf1   :  { %v643_v6 = vadd.f32 %v642_v0, %v641_v61  ;;  %v498_v13 = vadd.f32 %v668_v5, %v449_v4 }
  0xf2   :  { %v670_v7 = vpop.f32.mrf.mxu1 }
  0xf3   :  { %v452_v11 = vadd.f32 %v643_v6, %v565_v3  ;;  %v671_v12 = vadd.f32 %v670_v7, %v669_v1 }
  0xf5   :  { %v501_v22 = vadd.f32 %v671_v12, %v452_v11 }
 0x102   :  { %v700_v14 = vpop.f32.mrf.mxu0 }
 0x103   :  { %v547_v17 = vadd.f32 %v700_v14, %v498_v13 }
 0x104   :  { %v538_v19 = vpop.f32.mrf.mxu0 }
 0x105   :  { %v555_v20 = vmax.f32 %v547_v17, 0.0  ;;  %v539_v21 = vadd.f32 %v538_v19, %v490_v18 }
 0x106   :  { %v701_v23 = vpop.f32.mrf.mxu0 }
 0x107   :  { %559 = vst [vmem:[%s944_s3 + $0x10] sm:$0xff] %v555_v20  ;;  %v553_v24 = vmax.f32 %v539_v21, 0.0  ;;  %v550_v25 = vadd.f32 %v701_v23, %v501_v22 }
 0x108   :  { %v541_v27 = vpop.f32.mrf.mxu0 }
 0x109   :  { %557 = vst [vmem:[%s944_s3] sm:$0xff] %v553_v24  ;;  %v556_v28 = vmax.f32 %v550_v25, 0.0  ;;  %v542_v29 = vadd.f32 %v541_v27, %v493_v26 }
 0x10b   :  { %560 = vst [vmem:[%s944_s3 + $0x18] sm:$0xff] %v556_v28  ;;  %v554_v30 = vmax.f32 %v542_v29, 0.0 }
 0x10d   :  { %558 = vst [vmem:[%s944_s3 + $0x8] sm:$0xff] %v554_v30 }

// kernel: dqn_forward.7
= control target key start
LH: loop header
LB: loop body
LE: loop exit
PB: predicated region body
PF: predicated region fallthrough
CT: control target
= control target key end

     0   :  { %s2894_s1 = inlined_call_operand.vmem [shape: bf16[640,512], index: 1, kind: input, shape index: {}]   ;;  %s2895_s0 = inlined_call_operand.vmem [shape: bf16[16,640], index: 0, kind: input, shape index: {}]   ;;  %s2896_s3 = inlined_call_operand.vmem [shape: bf16[512,128], index: 3, kind: input, shape index: {}]   ;;  %s2897_s2 = inlined_call_operand.vmem [shape: f32[1,512], index: 2, kind: input, shape index: {}]   ;;  %s2898_s4 = inlined_call_operand.vmem [shape: f32[1,128], index: 4, kind: input, shape index: {}]   ;;  %s2899_s5 = inlined_call_operand.vmem [shape: f32[16,128], index: 5, kind: output, shape index: {}]  }
   0x1   :  { %v1963_v0 = vld [vmem:[%s2894_s1 + $0xe4] ss:$16 sps:$4 sm:$0xff]   ;;  %v1967_v2 = vld [vmem:[%s2894_s1 + $0xe0] ss:$16 sps:$4 sm:$0xff]  }
   0x2   :  { %v1965_v1 = vld [vmem:[%s2894_s1 + $0x2e4] ss:$16 sps:$4 sm:$0xff]   ;;  %1035 = vmatprep.subr.bf16.mxu0 %v1963_v0  ;;  %v1968_v3 = vld [vmem:[%s2894_s1 + $0x2e0] ss:$16 sps:$4 sm:$0xff]  }
   0x3   :  { %1078 = vmatprep.subr.bf16.mxu1 %v1965_v1  ;;  %v1969_v4 = vld [vmem:[%s2894_s1 + $0xc4] ss:$16 sps:$4 sm:$0xff]   ;;  %1036 = vmatpush1.bf16.msra.mxu0 %v1967_v2  ;;  %v1973_v6 = vld [vmem:[%s2894_s1 + $0xc0] ss:$16 sps:$4 sm:$0xff]  }
   0x4   :  { %1079 = vmatpush1.bf16.msra.mxu1 %v1968_v3  ;;  %v1971_v5 = vld [vmem:[%s2894_s1 + $0x2c4] ss:$16 sps:$4 sm:$0xff]   ;;  %1037 = vmatprep.subr.bf16.mxu0 %v1969_v4  ;;  %v1974_v7 = vld [vmem:[%s2894_s1 + $0x2c0] ss:$16 sps:$4 sm:$0xff]   ;;  %v2070_v3 = vld [vmem:[%s2894_s1 + $0xec] ss:$16 sps:$4 sm:$0xff]  }
   0x5   :  { %1080 = vmatprep.subr.bf16.mxu1 %v1971_v5  ;;  %v1975_v8 = vld [vmem:[%s2894_s1 + $0xa4] ss:$16 sps:$4 sm:$0xff]   ;;  %v1979_v10 = vld [vmem:[%s2894_s1 + $0xa0] ss:$16 sps:$4 sm:$0xff]   ;;  %v2488_v5 = vld [vmem:[%s2895_s0 + $0x8] ss:$20 sps:$4 sm:$0xff]  }
   0x6   :  { %v1977_v9 = vld [vmem:[%s2894_s1 + $0x2a4] ss:$16 sps:$4 sm:$0xff]   ;;  %v1980_v11 = vld [vmem:[%s2894_s1 + $0x2a0] ss:$16 sps:$4 sm:$0xff]  }
   0x7   :  { %1038 = vmatpush1.bf16.msra.mxu0 %v1973_v6  ;;  %v1981_v12 = vld [vmem:[%s2894_s1 + $0x84] ss:$16 sps:$4 sm:$0xff]   ;;  %v1985_v14 = vld [vmem:[%s2894_s1 + $0x80] ss:$16 sps:$4 sm:$0xff]  }
   0x8   :  { %1081 = vmatpush1.bf16.msra.mxu1 %v1974_v7  ;;  %1039 = vmatprep.subr.bf16.mxu0 %v1975_v8  ;;  %v1983_v13 = vld [vmem:[%s2894_s1 + $0x284] ss:$16 sps:$4 sm:$0xff]   ;;  %v1986_v15 = vld [vmem:[%s2894_s1 + $0x280] ss:$16 sps:$4 sm:$0xff]   ;;  %v2068_v7 = vld [vmem:[%s2894_s1 + $0xe8] ss:$16 sps:$4 sm:$0xff]  }
   0x9   :  { %1082 = vmatprep.subr.bf16.mxu1 %v1977_v9  ;;  %v1987_v16 = vld [vmem:[%s2894_s1 + $0x64] ss:$16 sps:$4 sm:$0xff]   ;;  %v1991_v18 = vld [vmem:[%s2894_s1 + $0x60] ss:$16 sps:$4 sm:$0xff]   ;;  %v2076_v9 = vld [vmem:[%s2894_s1 + $0xcc] ss:$16 sps:$4 sm:$0xff]  }
   0xa   :  { %v1989_v17 = vld [vmem:[%s2894_s1 + $0x264] ss:$16 sps:$4 sm:$0xff]   ;;  %v1992_v19 = vld [vmem:[%s2894_s1 + $0x260] ss:$16 sps:$4 sm:$0xff]  }
   0xb   :  { %1040 = vmatpush1.bf16.msra.mxu0 %v1979_v10  ;;  %v1993_v20 = vld [vmem:[%s2894_s1 + $0x44] ss:$16 sps:$4 sm:$0xff]   ;;  %v1997_v22 = vld [vmem:[%s2894_s1 + $0x40] ss:$16 sps:$4 sm:$0xff]  }
   0xc   :  { %1083 = vmatpush1.bf16.msra.mxu1 %v1980_v11  ;;  %1041 = vmatprep.subr.bf16.mxu0 %v1981_v12  ;;  %v1995_v21 = vld [vmem:[%s2894_s1 + $0x244] ss:$16 sps:$4 sm:$0xff]   ;;  %v1998_v23 = vld [vmem:[%s2894_s1 + $0x240] ss:$16 sps:$4 sm:$0xff]   ;;  %v2074_v11 = vld [vmem:[%s2894_s1 + $0xc8] ss:$16 sps:$4 sm:$0xff]  }
   0xd   :  { %1084 = vmatprep.subr.bf16.mxu1 %v1983_v13  ;;  %v1999_v24 = vld [vmem:[%s2894_s1 + $0x24] ss:$16 sps:$4 sm:$0xff]   ;;  %v2003_v26 = vld [vmem:[%s2894_s1 + $0x20] ss:$16 sps:$4 sm:$0xff]   ;;  %v2082_v13 = vld [vmem:[%s2894_s1 + $0xac] ss:$16 sps:$4 sm:$0xff]  }
   0xe   :  { %v2001_v25 = vld [vmem:[%s2894_s1 + $0x224] ss:$16 sps:$4 sm:$0xff]   ;;  %v2004_v27 = vld [vmem:[%s2894_s1 + $0x220] ss:$16 sps:$4 sm:$0xff]  }
   0xf   :  { %1042 = vmatpush1.bf16.msra.mxu0 %v1985_v14  ;;  %v2005_v28 = vld [vmem:[%s2894_s1 + $0x4] ss:$16 sps:$4 sm:$0xff]   ;;  %v2009_v30 = vld [vmem:[%s2894_s1] ss:$16 sps:$4 sm:$0xff]   ;;  %v2242_v14 = vmov 0  }
  0x10   :  { %1085 = vmatpush1.bf16.msra.mxu1 %v1986_v15  ;;  %1043 = vmatprep.subr.bf16.mxu0 %v1987_v16  ;;  %v2007_v29 = vld [vmem:[%s2894_s1 + $0x204] ss:$16 sps:$4 sm:$0xff]   ;;  %v2010_v31 = vld [vmem:[%s2894_s1 + $0x200] ss:$16 sps:$4 sm:$0xff]   ;;  %v2080_v16 = vld [vmem:[%s2894_s1 + $0xa8] ss:$16 sps:$4 sm:$0xff]  }
  0x11   :  { %1086 = vmatprep.subr.bf16.mxu1 %v1989_v17  ;;  %v2011_v32 = vld [vmem:[%s2894_s1 + $0x1e4] ss:$16 sps:$4 sm:$0xff]   ;;  %v2015_v34 = vld [vmem:[%s2894_s1 + $0x1e0] ss:$16 sps:$4 sm:$0xff]  }
  0x12   :  { %v2013_v33 = vld [vmem:[%s2894_s1 + $0x3e4] ss:$16 sps:$4 sm:$0xff]   ;;  %v2016_v35 = vld [vmem:[%s2894_s1 + $0x3e0] ss:$16 sps:$4 sm:$0xff]  }
  0x13   :  { %1044 = vmatpush1.bf16.msra.mxu0 %v1991_v18  ;;  %v2017_v36 = vld [vmem:[%s2894_s1 + $0x1c4] ss:$16 sps:$4 sm:$0xff]   ;;  %v2021_v38 = vld [vmem:[%s2894_s1 + $0x1c0] ss:$16 sps:$4 sm:$0xff]   ;;  %v2088_v18 = vld [vmem:[%s2894_s1 + $0x8c] ss:$16 sps:$4 sm:$0xff]  }
  0x14   :  { %1087 = vmatpush1.bf16.msra.mxu1 %v1992_v19  ;;  %1045 = vmatprep.subr.bf16.mxu0 %v1993_v20  ;;  %v2019_v37 = vld [vmem:[%s2894_s1 + $0x3c4] ss:$16 sps:$4 sm:$0xff]   ;;  %v2022_v39 = vld [vmem:[%s2894_s1 + $0x3c0] ss:$16 sps:$4 sm:$0xff]   ;;  %v2086_v20 = vld [vmem:[%s2894_s1 + $0x88] ss:$16 sps:$4 sm:$0xff]  }
  0x15   :  { %1088 = vmatprep.subr.bf16.mxu1 %v1995_v21  ;;  %v2023_v40 = vld [vmem:[%s2894_s1 + $0x1a4] ss:$16 sps:$4 sm:$0xff]   ;;  %v2027_v42 = vld [vmem:[%s2894_s1 + $0x1a0] ss:$16 sps:$4 sm:$0xff]  }
  0x16   :  { %v2025_v41 = vld [vmem:[%s2894_s1 + $0x3a4] ss:$16 sps:$4 sm:$0xff]   ;;  %v2028_v43 = vld [vmem:[%s2894_s1 + $0x3a0] ss:$16 sps:$4 sm:$0xff]  }
  0x17   :  { %1046 = vmatpush1.bf16.msra.mxu0 %v1997_v22  ;;  %v2029_v44 = vld [vmem:[%s2894_s1 + $0x184] ss:$16 sps:$4 sm:$0xff]   ;;  %v2033_v46 = vld [vmem:[%s2894_s1 + $0x180] ss:$16 sps:$4 sm:$0xff]   ;;  %v2094_v22 = vld [vmem:[%s2894_s1 + $0x6c] ss:$16 sps:$4 sm:$0xff]  }
  0x18   :  { %1089 = vmatpush1.bf16.msra.mxu1 %v1998_v23  ;;  %1047 = vmatprep.subr.bf16.mxu0 %v1999_v24  ;;  %v2031_v45 = vld [vmem:[%s2894_s1 + $0x384] ss:$16 sps:$4 sm:$0xff]   ;;  %v2034_v47 = vld [vmem:[%s2894_s1 + $0x380] ss:$16 sps:$4 sm:$0xff]   ;;  %v2092_v24 = vld [vmem:[%s2894_s1 + $0x68] ss:$16 sps:$4 sm:$0xff]  }
  0x19   :  { %1090 = vmatprep.subr.bf16.mxu1 %v2001_v25  ;;  %v2035_v48 = vld [vmem:[%s2894_s1 + $0x164] ss:$16 sps:$4 sm:$0xff]   ;;  %v2429_v51 = vld [vmem:[%s2895_s0 + $0xc] ss:$20 sps:$4 sm:$0xff]  }
  0x1a   :  { %v2061_v49 = vld [vmem:[%s2895_s0 + $0x4] ss:$20 sps:$4 sm:$0xff]   ;;  %v2039_v52 = vld [vmem:[%s2894_s1 + $0x160] ss:$16 sps:$4 sm:$0xff]   ;;  %1110 = vmatprep.mubr.bf16.mxu1 %v2429_v51 }
  0x1b   :  { %1048 = vmatpush1.bf16.msra.mxu0 %v2003_v26  ;;  %v2037_v50 = vld [vmem:[%s2894_s1 + $0x364] ss:$16 sps:$4 sm:$0xff]   ;;  %1067 = vmatprep.mubr.bf16.mxu0 %v2061_v49  ;;  %v2040_v53 = vld [vmem:[%s2894_s1 + $0x360] ss:$16 sps:$4 sm:$0xff]   ;;  %v2100_v26 = vld [vmem:[%s2894_s1 + $0x4c] ss:$16 sps:$4 sm:$0xff]  }
  0x1c   :  { %1091 = vmatpush1.bf16.msra.mxu1 %v2004_v27  ;;  %1049 = vmatprep.subr.bf16.mxu0 %v2005_v28  ;;  %v2041_v54 = vld [vmem:[%s2894_s1 + $0x144] ss:$16 sps:$4 sm:$0xff]   ;;  %v2045_v56 = vld [vmem:[%s2894_s1 + $0x140] ss:$16 sps:$4 sm:$0xff]   ;;  %v2098_v28 = vld [vmem:[%s2894_s1 + $0x48] ss:$16 sps:$4 sm:$0xff]  }
  0x1d   :  { %1092 = vmatprep.subr.bf16.mxu1 %v2007_v29  ;;  %v2043_v55 = vld [vmem:[%s2894_s1 + $0x344] ss:$16 sps:$4 sm:$0xff]   ;;  %v2046_v57 = vld [vmem:[%s2894_s1 + $0x340] ss:$16 sps:$4 sm:$0xff]  }
  0x1e   :  { %v2047_v58 = vld [vmem:[%s2894_s1 + $0x124] ss:$16 sps:$4 sm:$0xff]   ;;  %v2051_v60 = vld [vmem:[%s2894_s1 + $0x120] ss:$16 sps:$4 sm:$0xff]  }
  0x1f   :  { %1050 = vmatpush1.bf16.msra.mxu0 %v2009_v30  ;;  %v2049_v59 = vld [vmem:[%s2894_s1 + $0x324] ss:$16 sps:$4 sm:$0xff]   ;;  %v2052_v61 = vld [vmem:[%s2894_s1 + $0x320] ss:$16 sps:$4 sm:$0xff]   ;;  %v2106_v30 = vld [vmem:[%s2894_s1 + $0x2c] ss:$16 sps:$4 sm:$0xff]  }
  0x20   :  { %1093 = vmatpush1.bf16.msra.mxu1 %v2010_v31  ;;  %1051 = vmatprep.subr.bf16.mxu0 %v2011_v32  ;;  %v2053_v62 = vld [vmem:[%s2894_s1 + $0x104] ss:$16 sps:$4 sm:$0xff]   ;;  %v2057_v0 = vld [vmem:[%s2894_s1 + $0x100] ss:$16 sps:$4 sm:$0xff]   ;;  %v2104_v32 = vld [vmem:[%s2894_s1 + $0x28] ss:$16 sps:$4 sm:$0xff]  }
  0x21   :  { %1094 = vmatprep.subr.bf16.mxu1 %v2013_v33  ;;  %v2055_v63 = vld [vmem:[%s2894_s1 + $0x304] ss:$16 sps:$4 sm:$0xff]   ;;  %v2058_v1 = vld [vmem:[%s2894_s1 + $0x300] ss:$16 sps:$4 sm:$0xff]  }
  0x22   :  { %v2067_v2 = vld [vmem:[%s2894_s1 + $0x4e4] ss:$16 sps:$4 sm:$0xff]   ;;  %v2065_v6 = vld [vmem:[%s2894_s1 + $0x4e0] ss:$16 sps:$4 sm:$0xff]  }
  0x23   :  { %1052 = vmatpush2.bf16.msra.mxu0 %v2015_v34  ;;  %v2483_v4 = vld [vmem:[%s2895_s0] ss:$20 sps:$4 sm:$0xff]   ;;  %v2112_v34 = vld [vmem:[%s2894_s1 + $0xc] ss:$16 sps:$4 sm:$0xff]  }
  0x24   :  { %1095 = vmatpush2.bf16.msra.mxu1 %v2016_v35  ;;  %1053 = vmatprep.subr.bf16.mxu0 %v2017_v36  ;;  %v2073_v8 = vld [vmem:[%s2894_s1 + $0x4c4] ss:$16 sps:$4 sm:$0xff]   ;;  %v2071_v10 = vld [vmem:[%s2894_s1 + $0x4c0] ss:$16 sps:$4 sm:$0xff]   ;;  %v2110_v36 = vld [vmem:[%s2894_s1 + $0x8] ss:$16 sps:$4 sm:$0xff]  }
  0x25   :  { %1096 = vmatprep.subr.bf16.mxu1 %v2019_v37  ;;  %v2079_v12 = vld [vmem:[%s2894_s1 + $0x4a4] ss:$16 sps:$4 sm:$0xff]   ;;  %v2077_v15 = vld [vmem:[%s2894_s1 + $0x4a0] ss:$16 sps:$4 sm:$0xff]   ;;  %v2116_v37 = vld [vmem:[%s2894_s1 + $0x1ec] ss:$16 sps:$4 sm:$0xff]  }
  0x26   :  { %v2085_v17 = vld [vmem:[%s2894_s1 + $0x484] ss:$16 sps:$4 sm:$0xff]   ;;  %v2083_v19 = vld [vmem:[%s2894_s1 + $0x480] ss:$16 sps:$4 sm:$0xff]  }
  0x27   :  { %1054 = vmatpush2.bf16.msra.mxu0 %v2021_v38  ;;  %v2091_v21 = vld [vmem:[%s2894_s1 + $0x464] ss:$16 sps:$4 sm:$0xff]   ;;  %v2089_v23 = vld [vmem:[%s2894_s1 + $0x460] ss:$16 sps:$4 sm:$0xff]   ;;  %v2119_v38 = vld [vmem:[%s2894_s1 + $0x2ec] ss:$16 sps:$4 sm:$0xff]  }
  0x28   :  { %1097 = vmatpush2.bf16.msra.mxu1 %v2022_v39  ;;  %1055 = vmatprep.subr.bf16.mxu0 %v2023_v40  ;;  %v2097_v25 = vld [vmem:[%s2894_s1 + $0x444] ss:$16 sps:$4 sm:$0xff]   ;;  %v2095_v27 = vld [vmem:[%s2894_s1 + $0x440] ss:$16 sps:$4 sm:$0xff]   ;;  %v2114_v40 = vld [vmem:[%s2894_s1 + $0x1e8] ss:$16 sps:$4 sm:$0xff]  }
  0x29   :  { %1098 = vmatprep.subr.bf16.mxu1 %v2025_v41  ;;  %v2103_v29 = vld [vmem:[%s2894_s1 + $0x424] ss:$16 sps:$4 sm:$0xff]   ;;  %v2101_v31 = vld [vmem:[%s2894_s1 + $0x420] ss:$16 sps:$4 sm:$0xff]   ;;  %v2117_v41 = vld [vmem:[%s2894_s1 + $0x2e8] ss:$16 sps:$4 sm:$0xff]  }
  0x2a   :  { %v2109_v33 = vld [vmem:[%s2894_s1 + $0x404] ss:$16 sps:$4 sm:$0xff]   ;;  %v2107_v35 = vld [vmem:[%s2894_s1 + $0x400] ss:$16 sps:$4 sm:$0xff]  }
  0x2b   :  { %1056 = vmatpush2.bf16.msra.mxu0 %v2027_v42  ;;  %v2592_v39 = vld [vmem:[%s2895_s0 + $0x10] ss:$20 sps:$4 sm:$0xff]   ;;  %v2122_v42 = vld [vmem:[%s2894_s1 + $0x1cc] ss:$16 sps:$4 sm:$0xff]  }
  0x2c   :  { %1099 = vmatpush2.bf16.msra.mxu1 %v2028_v43  ;;  %1057 = vmatprep.subr.bf16.mxu0 %v2029_v44  ;;  %v2125_v43 = vld [vmem:[%s2894_s1 + $0x2cc] ss:$16 sps:$4 sm:$0xff]   ;;  %v2120_v44 = vld [vmem:[%s2894_s1 + $0x1c8] ss:$16 sps:$4 sm:$0xff]  }
  0x2d   :  { %1100 = vmatprep.subr.bf16.mxu1 %v2031_v45  ;;  %v2123_v45 = vld [vmem:[%s2894_s1 + $0x2c8] ss:$16 sps:$4 sm:$0xff]  }
  0x2f   :  { %1058 = vmatpush2.bf16.msra.mxu0 %v2033_v46  ;;  %v2128_v46 = vld [vmem:[%s2894_s1 + $0x1ac] ss:$16 sps:$4 sm:$0xff]  }
  0x30   :  { %1101 = vmatpush2.bf16.msra.mxu1 %v2034_v47  ;;  %1059 = vmatprep.subr.bf16.mxu0 %v2035_v48  ;;  %v2131_v47 = vld [vmem:[%s2894_s1 + $0x2ac] ss:$16 sps:$4 sm:$0xff]   ;;  %v2126_v48 = vld [vmem:[%s2894_s1 + $0x1a8] ss:$16 sps:$4 sm:$0xff]  }
  0x31   :  { %1102 = vmatprep.subr.bf16.mxu1 %v2037_v50  ;;  %v2134_v50 = vld [vmem:[%s2894_s1 + $0x18c] ss:$16 sps:$4 sm:$0xff]  }
  0x33   :  { %1060 = vmatpush2.bf16.msra.mxu0 %v2039_v52  ;;  %v2132_v52 = vld [vmem:[%s2894_s1 + $0x188] ss:$16 sps:$4 sm:$0xff]  }
  0x34   :  { %1103 = vmatpush2.bf16.msra.mxu1 %v2040_v53  ;;  %1061 = vmatprep.subr.bf16.mxu0 %v2041_v54  ;;  %v2135_v53 = vld [vmem:[%s2894_s1 + $0x288] ss:$16 sps:$4 sm:$0xff]   ;;  %v2140_v54 = vld [vmem:[%s2894_s1 + $0x16c] ss:$16 sps:$4 sm:$0xff]  }
  0x35   :  { %1104 = vmatprep.subr.bf16.mxu1 %v2043_v55  ;;  %v2143_v55 = vld [vmem:[%s2894_s1 + $0x26c] ss:$16 sps:$4 sm:$0xff]  }
  0x37   :  { %1062 = vmatpush2.bf16.msra.mxu0 %v2045_v56  ;;  %v2138_v56 = vld [vmem:[%s2894_s1 + $0x168] ss:$16 sps:$4 sm:$0xff]  }
  0x38   :  { %1105 = vmatpush2.bf16.msra.mxu1 %v2046_v57  ;;  %1063 = vmatprep.subr.bf16.mxu0 %v2047_v58  ;;  %v2141_v57 = vld [vmem:[%s2894_s1 + $0x268] ss:$16 sps:$4 sm:$0xff]   ;;  %v2146_v58 = vld [vmem:[%s2894_s1 + $0x14c] ss:$16 sps:$4 sm:$0xff]  }
  0x39   :  { %1106 = vmatprep.subr.bf16.mxu1 %v2049_v59  ;;  %v2149_v59 = vld [vmem:[%s2894_s1 + $0x24c] ss:$16 sps:$4 sm:$0xff]  }
  0x3b   :  { %1064 = vmatpush2.bf16.msra.mxu0 %v2051_v60  ;;  %v2144_v60 = vld [vmem:[%s2894_s1 + $0x148] ss:$16 sps:$4 sm:$0xff]  }
  0x3c   :  { %1107 = vmatpush2.bf16.msra.mxu1 %v2052_v61  ;;  %1065 = vmatprep.subr.bf16.mxu0 %v2053_v62  ;;  %v2147_v61 = vld [vmem:[%s2894_s1 + $0x248] ss:$16 sps:$4 sm:$0xff]   ;;  %v2152_v62 = vld [vmem:[%s2894_s1 + $0x12c] ss:$16 sps:$4 sm:$0xff]  }
  0x3d   :  { %1108 = vmatprep.subr.bf16.mxu1 %v2055_v63  ;;  %v2155_v63 = vld [vmem:[%s2894_s1 + $0x22c] ss:$16 sps:$4 sm:$0xff]  }
  0x3f   :  { %1066 = vmatpush2.bf16.msra.mxu0 %v2057_v0  ;;  %v2150_v0 = vld [vmem:[%s2894_s1 + $0x128] ss:$16 sps:$4 sm:$0xff]  }
  0x40   :  { %1109 = vmatpush2.bf16.msra.mxu1 %v2058_v1  ;;  %1121 = vmatprep.subr.bf16.mxu0 %v2067_v2  ;;  %v2153_v1 = vld [vmem:[%s2894_s1 + $0x228] ss:$16 sps:$4 sm:$0xff]   ;;  %v2158_v2 = vld [vmem:[%s2894_s1 + $0x10c] ss:$16 sps:$4 sm:$0xff]  }
  0x41   :  { %1164 = vmatprep.subr.bf16.mxu1 %v2070_v3  ;;  %v2161_v3 = vld [vmem:[%s2894_s1 + $0x20c] ss:$16 sps:$4 sm:$0xff]  }
  0x42   :  { %1068 = vmatmul.mubr.bf16.vlgmr.msra.gmra.mxu0 %v2483_v4 }
  0x43   :  { %1111 = vmatmul.mubr.bf16.vlgmr.msra.gmra.mxu1 %v2488_v5  ;;  %1122 = vmatpush1.bf16.msra.mxu0 %v2065_v6  ;;  %v2156_v6 = vld [vmem:[%s2894_s1 + $0x108] ss:$16 sps:$4 sm:$0xff]  }
  0x44   :  { %1165 = vmatpush1.bf16.msra.mxu1 %v2068_v7  ;;  %1123 = vmatprep.subr.bf16.mxu0 %v2073_v8  ;;  %v2159_v7 = vld [vmem:[%s2894_s1 + $0x208] ss:$16 sps:$4 sm:$0xff]   ;;  %v2164_v8 = vld [vmem:[%s2894_s1 + $0x3ec] ss:$16 sps:$4 sm:$0xff]  }
  0x45   :  { %1166 = vmatprep.subr.bf16.mxu1 %v2076_v9  ;;  %1153 = vmatprep.mubr.bf16.mxu0 %v2242_v14  ;;  %v2167_v9 = vld [vmem:[%s2894_s1 + $0x4ec] ss:$16 sps:$4 sm:$0xff]  }
  0x46   :  { %1196 = vmatprep.mubr.bf16.mxu1 %v2061_v49  ;;  %v2129_v49 = vld [vmem:[%s2894_s1 + $0x2a8] ss:$16 sps:$4 sm:$0xff]  }
  0x47   :  { %1124 = vmatpush1.bf16.msra.mxu0 %v2071_v10  ;;  %v2162_v10 = vld [vmem:[%s2894_s1 + $0x3e8] ss:$16 sps:$4 sm:$0xff]  }
  0x48   :  { %1167 = vmatpush1.bf16.msra.mxu1 %v2074_v11  ;;  %1125 = vmatprep.subr.bf16.mxu0 %v2079_v12  ;;  %v2165_v11 = vld [vmem:[%s2894_s1 + $0x4e8] ss:$16 sps:$4 sm:$0xff]   ;;  %v2170_v12 = vld [vmem:[%s2894_s1 + $0x3cc] ss:$16 sps:$4 sm:$0xff]  }
  0x49   :  { %1168 = vmatprep.subr.bf16.mxu1 %v2082_v13  ;;  %v2173_v13 = vld [vmem:[%s2894_s1 + $0x4cc] ss:$16 sps:$4 sm:$0xff]  }
  0x4b   :  { %1126 = vmatpush1.bf16.msra.mxu0 %v2077_v15  ;;  %v2168_v15 = vld [vmem:[%s2894_s1 + $0x3c8] ss:$16 sps:$4 sm:$0xff]  }
  0x4c   :  { %1169 = vmatpush1.bf16.msra.mxu1 %v2080_v16  ;;  %1127 = vmatprep.subr.bf16.mxu0 %v2085_v17  ;;  %v2171_v16 = vld [vmem:[%s2894_s1 + $0x4c8] ss:$16 sps:$4 sm:$0xff]   ;;  %v2176_v17 = vld [vmem:[%s2894_s1 + $0x3ac] ss:$16 sps:$4 sm:$0xff]  }
  0x4d   :  { %1170 = vmatprep.subr.bf16.mxu1 %v2088_v18  ;;  %v2174_v18 = vld [vmem:[%s2894_s1 + $0x3a8] ss:$16 sps:$4 sm:$0xff]  }
  0x4f   :  { %1128 = vmatpush1.bf16.msra.mxu0 %v2083_v19  ;;  %v2177_v19 = vld [vmem:[%s2894_s1 + $0x4a8] ss:$16 sps:$4 sm:$0xff]  }
  0x50   :  { %1171 = vmatpush1.bf16.msra.mxu1 %v2086_v20  ;;  %1129 = vmatprep.subr.bf16.mxu0 %v2091_v21  ;;  %v2182_v20 = vld [vmem:[%s2894_s1 + $0x38c] ss:$16 sps:$4 sm:$0xff]   ;;  %v2180_v21 = vld [vmem:[%s2894_s1 + $0x388] ss:$16 sps:$4 sm:$0xff]  }
  0x51   :  { %1172 = vmatprep.subr.bf16.mxu1 %v2094_v22  ;;  %v2183_v22 = vld [vmem:[%s2894_s1 + $0x488] ss:$16 sps:$4 sm:$0xff]  }
  0x53   :  { %1130 = vmatpush1.bf16.msra.mxu0 %v2089_v23  ;;  %v2188_v23 = vld [vmem:[%s2894_s1 + $0x36c] ss:$16 sps:$4 sm:$0xff]  }
  0x54   :  { %1173 = vmatpush1.bf16.msra.mxu1 %v2092_v24  ;;  %1131 = vmatprep.subr.bf16.mxu0 %v2097_v25  ;;  %v2191_v24 = vld [vmem:[%s2894_s1 + $0x46c] ss:$16 sps:$4 sm:$0xff]   ;;  %v2186_v25 = vld [vmem:[%s2894_s1 + $0x368] ss:$16 sps:$4 sm:$0xff]  }
  0x55   :  { %1174 = vmatprep.subr.bf16.mxu1 %v2100_v26  ;;  %v2189_v26 = vld [vmem:[%s2894_s1 + $0x468] ss:$16 sps:$4 sm:$0xff]  }
  0x57   :  { %1132 = vmatpush1.bf16.msra.mxu0 %v2095_v27  ;;  %v2194_v27 = vld [vmem:[%s2894_s1 + $0x34c] ss:$16 sps:$4 sm:$0xff]  }
  0x58   :  { %1175 = vmatpush1.bf16.msra.mxu1 %v2098_v28  ;;  %1133 = vmatprep.subr.bf16.mxu0 %v2103_v29  ;;  %v2197_v28 = vld [vmem:[%s2894_s1 + $0x44c] ss:$16 sps:$4 sm:$0xff]   ;;  %v2192_v29 = vld [vmem:[%s2894_s1 + $0x348] ss:$16 sps:$4 sm:$0xff]  }
  0x59   :  { %1176 = vmatprep.subr.bf16.mxu1 %v2106_v30  ;;  %v2195_v30 = vld [vmem:[%s2894_s1 + $0x448] ss:$16 sps:$4 sm:$0xff]  }
  0x5b   :  { %1134 = vmatpush1.bf16.msra.mxu0 %v2101_v31  ;;  %v2200_v31 = vld [vmem:[%s2894_s1 + $0x32c] ss:$16 sps:$4 sm:$0xff]  }
  0x5c   :  { %1177 = vmatpush1.bf16.msra.mxu1 %v2104_v32  ;;  %1135 = vmatprep.subr.bf16.mxu0 %v2109_v33  ;;  %v2203_v32 = vld [vmem:[%s2894_s1 + $0x42c] ss:$16 sps:$4 sm:$0xff]   ;;  %v2198_v33 = vld [vmem:[%s2894_s1 + $0x328] ss:$16 sps:$4 sm:$0xff]  }
  0x5d   :  { %1178 = vmatprep.subr.bf16.mxu1 %v2112_v34  ;;  %v2201_v34 = vld [vmem:[%s2894_s1 + $0x428] ss:$16 sps:$4 sm:$0xff]  }
  0x5f   :  { %1136 = vmatpush1.bf16.msra.mxu0 %v2107_v35  ;;  %v2206_v35 = vld [vmem:[%s2894_s1 + $0x30c] ss:$16 sps:$4 sm:$0xff]  }
  0x60   :  { %1179 = vmatpush1.bf16.msra.mxu1 %v2110_v36  ;;  %1207 = vmatprep.subr.bf16.mxu0 %v2119_v38  ;;  %v2209_v36 = vld [vmem:[%s2894_s1 + $0x40c] ss:$16 sps:$4 sm:$0xff]   ;;  %v2207_v38 = vld [vmem:[%s2894_s1 + $0x408] ss:$16 sps:$4 sm:$0xff]  }
  0x61   :  { %1180 = vmatprep.subr.bf16.mxu1 %v2116_v37  ;;  %v2204_v37 = vld [vmem:[%s2894_s1 + $0x308] ss:$16 sps:$4 sm:$0xff]  }
  0x62   :  { %1154 = vmatmul.mubr.bf16.vlgmr.msra.gmra.mxu0 %v2592_v39 }
  0x63   :  { %1208 = vmatpush1.bf16.msra.mxu0 %v2117_v41  ;;  %1239 = vmatprep.mubr.bf16.mxu0 %v2429_v51  ;;  %v2137_v51 = vld [vmem:[%s2894_s1 + $0x28c] ss:$16 sps:$4 sm:$0xff]  }
  0x64   :  { %1181 = vmatpush2.bf16.msra.mxu1 %v2114_v40  ;;  %1209 = vmatprep.subr.bf16.mxu0 %v2125_v43  ;;  %v2210_v40 = vld [vmem:[%s2896_s3 + $0x78] sm:$0xff]   ;;  %v2213_v43 = vld [vmem:[%s2896_s3 + $0x30] sm:$0xff]  }
  0x65   :  { %1182 = vmatprep.subr.bf16.mxu1 %v2122_v42  ;;  %v2211_v41 = vld [vmem:[%s2896_s3 + $0x38] sm:$0xff]   ;;  %v2212_v42 = vld [vmem:[%s2896_s3 + $0x70] sm:$0xff]  }
  0x67   :  { %1210 = vmatpush1.bf16.msra.mxu0 %v2123_v45  ;;  %v2215_v45 = vld [vmem:[%s2896_s3 + $0x28] sm:$0xff]  }
  0x68   :  { %1183 = vmatpush2.bf16.msra.mxu1 %v2120_v44  ;;  %1211 = vmatprep.subr.bf16.mxu0 %v2131_v47  ;;  %v2214_v44 = vld [vmem:[%s2896_s3 + $0x68] sm:$0xff]   ;;  %v2219_v47 = vld [vmem:[%s2896_s3 + $0x18] sm:$0xff]  }
  0x69   :  { %1184 = vmatprep.subr.bf16.mxu1 %v2128_v46  ;;  %v2218_v46 = vld [vmem:[%s2896_s3 + $0x58] sm:$0xff]  }
  0x6b   :  { %1212 = vmatpush1.bf16.msra.mxu0 %v2129_v49  ;;  %v2221_v49 = vld [vmem:[%s2896_s3 + $0x10] sm:$0xff]  }
  0x6c   :  { %1185 = vmatpush2.bf16.msra.mxu1 %v2126_v48  ;;  %1213 = vmatprep.subr.bf16.mxu0 %v2137_v51  ;;  %v2220_v48 = vld [vmem:[%s2896_s3 + $0x50] sm:$0xff]   ;;  %v2223_v51 = vld [vmem:[%s2896_s3 + $0x8] sm:$0xff]  }
  0x6d   :  { %1186 = vmatprep.subr.bf16.mxu1 %v2134_v50  ;;  %v2222_v50 = vld [vmem:[%s2896_s3 + $0x48] sm:$0xff]  }
  0x6f   :  { %1214 = vmatpush1.bf16.msra.mxu0 %v2135_v53  ;;  %v2225_v53 = vld [vmem:[%s2896_s3] sm:$0xff]  }
  0x70   :  { %1187 = vmatpush2.bf16.msra.mxu1 %v2132_v52  ;;  %1215 = vmatprep.subr.bf16.mxu0 %v2143_v55  ;;  %v2224_v52 = vld [vmem:[%s2896_s3 + $0x40] sm:$0xff]   ;;  %v2227_v55 = vld [vmem:[%s2896_s3 + $0xb8] sm:$0xff]  }
  0x71   :  { %1188 = vmatprep.subr.bf16.mxu1 %v2140_v54  ;;  %v2226_v54 = vld [vmem:[%s2896_s3 + $0xf8] sm:$0xff]  }
  0x73   :  { %1216 = vmatpush1.bf16.msra.mxu0 %v2141_v57  ;;  %v2229_v57 = vld [vmem:[%s2896_s3 + $0xb0] sm:$0xff]  }
  0x74   :  { %1189 = vmatpush2.bf16.msra.mxu1 %v2138_v56  ;;  %1217 = vmatprep.subr.bf16.mxu0 %v2149_v59  ;;  %v2228_v56 = vld [vmem:[%s2896_s3 + $0xf0] sm:$0xff]   ;;  %v2231_v59 = vld [vmem:[%s2896_s3 + $0xa8] sm:$0xff]  }
  0x75   :  { %1190 = vmatprep.subr.bf16.mxu1 %v2146_v58  ;;  %v2230_v58 = vld [vmem:[%s2896_s3 + $0xe8] sm:$0xff]  }
  0x77   :  { %1218 = vmatpush1.bf16.msra.mxu0 %v2147_v61  ;;  %v2233_v61 = vld [vmem:[%s2896_s3 + $0xa0] sm:$0xff]  }
  0x78   :  { %1191 = vmatpush2.bf16.msra.mxu1 %v2144_v60  ;;  %1219 = vmatprep.subr.bf16.mxu0 %v2155_v63  ;;  %v2232_v60 = vld [vmem:[%s2896_s3 + $0xe0] sm:$0xff]   ;;  %v2235_v63 = vld [vmem:[%s2896_s3 + $0x98] sm:$0xff]  }
  0x79   :  { %1192 = vmatprep.subr.bf16.mxu1 %v2152_v62  ;;  %v2234_v62 = vld [vmem:[%s2896_s3 + $0xd8] sm:$0xff]  }
  0x7b   :  { %1220 = vmatpush1.bf16.msra.mxu0 %v2153_v1  ;;  %v2237_v1 = vld [vmem:[%s2896_s3 + $0x90] sm:$0xff]  }
  0x7c   :  { %1193 = vmatpush2.bf16.msra.mxu1 %v2150_v0  ;;  %1221 = vmatprep.subr.bf16.mxu0 %v2161_v3  ;;  %v2236_v0 = vld [vmem:[%s2896_s3 + $0xd0] sm:$0xff]   ;;  %v2239_v3 = vld [vmem:[%s2896_s3 + $0x88] sm:$0xff]  }
  0x7d   :  { %1194 = vmatprep.subr.bf16.mxu1 %v2158_v2  ;;  %v2238_v2 = vld [vmem:[%s2896_s3 + $0xc8] sm:$0xff]  }
  0x7f   :  { %1222 = vmatpush1.bf16.msra.mxu0 %v2159_v7  ;;  %v2241_v7 = vld [vmem:[%s2896_s3 + $0x80] sm:$0xff]  }
  0x80   :  { %1195 = vmatpush2.bf16.msra.mxu1 %v2156_v6  ;;  %1223 = vmatprep.subr.bf16.mxu0 %v2164_v8  ;;  %v2240_v6 = vld [vmem:[%s2896_s3 + $0xc0] sm:$0xff]   ;;  %v189_v8 = vlaneseq }
  0x81   :  { %1250 = vmatprep.subr.bf16.mxu1 %v2167_v9 }
  0x83   :  { %1197 = vmatmul.mubr.bf16.vlgmr.msra.gmra.mxu1 %v2483_v4  ;;  %1224 = vmatpush2.bf16.msra.mxu0 %v2162_v10  ;;  %v2179_v4 = vld [vmem:[%s2894_s1 + $0x4ac] ss:$16 sps:$4 sm:$0xff]   ;;  %v190_v10 = vshrl.u32 %v189_v8, 7 }
  0x84   :  { %1251 = vmatpush1.bf16.msra.mxu1 %v2165_v11  ;;  %1225 = vmatprep.subr.bf16.mxu0 %v2170_v12 }
  0x85   :  { %1252 = vmatprep.subr.bf16.mxu1 %v2173_v13  ;;  %1282 = vmatprep.mubr.bf16.mxu1 %v2242_v14  ;;  %v2185_v14 = vld [vmem:[%s2894_s1 + $0x48c] ss:$16 sps:$4 sm:$0xff]   ;;  %v195_v12 = vsub.s32 1, %v190_v10  ;;  %v187_v13 = vld [vmem:[%s2897_s2] sm:$0xf] }
  0x87   :  { %1226 = vmatpush2.bf16.msra.mxu0 %v2168_v15  ;;  %v191_v15 = vsub.s32 0, %v190_v10 }
  0x88   :  { %1253 = vmatpush1.bf16.msra.mxu1 %v2171_v16  ;;  %1227 = vmatprep.subr.bf16.mxu0 %v2176_v17 }
  0x89   :  { %1254 = vmatprep.subr.bf16.mxu1 %v2179_v4  ;;  %v196_v4 = vrot.slane %v187_v13, %v195_v12 }
  0x8b   :  { %1228 = vmatpush2.bf16.msra.mxu0 %v2174_v18  ;;  %v192_v18 = vrot.slane %v187_v13, %v191_v15 }
  0x8c   :  { %1255 = vmatpush1.bf16.msra.mxu1 %v2177_v19  ;;  %1229 = vmatprep.subr.bf16.mxu0 %v2182_v20 }
  0x8d   :  { %1256 = vmatprep.subr.bf16.mxu1 %v2185_v14 }
  0x8f   :  { %1230 = vmatpush2.bf16.msra.mxu0 %v2180_v21 }
  0x90   :  { %1257 = vmatpush1.bf16.msra.mxu1 %v2183_v22  ;;  %1231 = vmatprep.subr.bf16.mxu0 %v2188_v23 }
  0x91   :  { %1258 = vmatprep.subr.bf16.mxu1 %v2191_v24 }
  0x93   :  { %1232 = vmatpush2.bf16.msra.mxu0 %v2186_v25 }
  0x94   :  { %1259 = vmatpush1.bf16.msra.mxu1 %v2189_v26  ;;  %1233 = vmatprep.subr.bf16.mxu0 %v2194_v27 }
  0x95   :  { %1260 = vmatprep.subr.bf16.mxu1 %v2197_v28 }
  0x97   :  { %1234 = vmatpush2.bf16.msra.mxu0 %v2192_v29 }
  0x98   :  { %1261 = vmatpush1.bf16.msra.mxu1 %v2195_v30  ;;  %1235 = vmatprep.subr.bf16.mxu0 %v2200_v31 }
  0x99   :  { %1262 = vmatprep.subr.bf16.mxu1 %v2203_v32 }
  0x9b   :  { %1236 = vmatpush2.bf16.msra.mxu0 %v2198_v33 }
  0x9c   :  { %1263 = vmatpush1.bf16.msra.mxu1 %v2201_v34  ;;  %1237 = vmatprep.subr.bf16.mxu0 %v2206_v35 }
  0x9d   :  { %1264 = vmatprep.subr.bf16.mxu1 %v2209_v36 }
  0x9f   :  { %1238 = vmatpush2.bf16.msra.mxu0 %v2204_v37 }
  0xa0   :  { %1265 = vmatpush1.bf16.msra.mxu1 %v2207_v38  ;;  %1918 = vmatprep.subr.bf16.mxu0 %v2210_v40 }
  0xa1   :  { %1940 = vmatprep.subr.bf16.mxu1 %v2226_v54 }
  0xa2   :  { %1240 = vmatmul.mubr.bf16.vlgmr.msra.gmra.mxu0 %v2488_v5  ;;  %v2216_v5 = vld [vmem:[%s2896_s3 + $0x60] sm:$0xff]  }
  0xa3   :  { %1283 = vmatmul.mubr.bf16.vlgmr.msra.gmra.mxu1 %v2592_v39  ;;  %1919 = vmatpush3.bf16.msra.mxu0 %v2211_v41  ;;  %v2217_v39 = vld [vmem:[%s2896_s3 + $0x20] sm:$0xff]  }
  0xa4   :  { %1920 = vmatprep.subr.bf16.mxu0 %v2212_v42  ;;  %1941 = vmatpush3.bf16.msra.mxu1 %v2227_v55 }
  0xa5   :  { %1942 = vmatprep.subr.bf16.mxu1 %v2228_v56 }
  0xa7   :  { %1921 = vmatpush3.bf16.msra.mxu0 %v2213_v43 }
  0xa8   :  { %1922 = vmatprep.subr.bf16.mxu0 %v2214_v44  ;;  %1943 = vmatpush3.bf16.msra.mxu1 %v2229_v57 }
  0xa9   :  { %1944 = vmatprep.subr.bf16.mxu1 %v2230_v58 }
  0xab   :  { %1923 = vmatpush3.bf16.msra.mxu0 %v2215_v45 }
  0xac   :  { %1924 = vmatprep.subr.bf16.mxu0 %v2216_v5  ;;  %1945 = vmatpush3.bf16.msra.mxu1 %v2231_v59 }
  0xad   :  { %1946 = vmatprep.subr.bf16.mxu1 %v2232_v60 }
  0xaf   :  { %1925 = vmatpush3.bf16.msra.mxu0 %v2217_v39  ;;  %v203_v39 = vsub.s32 3, %v190_v10 }
  0xb0   :  { %1926 = vmatprep.subr.bf16.mxu0 %v2218_v46  ;;  %1947 = vmatpush3.bf16.msra.mxu1 %v2233_v61  ;;  %v199_v46 = vsub.s32 2, %v190_v10 }
  0xb1   :  { %1948 = vmatprep.subr.bf16.mxu1 %v2234_v62 }
  0xb3   :  { %1927 = vmatpush3.bf16.msra.mxu0 %v2219_v47 }
  0xb4   :  { %1928 = vmatprep.subr.bf16.mxu0 %v2220_v48  ;;  %1949 = vmatpush3.bf16.msra.mxu1 %v2235_v63  ;;  %v204_v48 = vrot.slane %v187_v13, %v203_v39 }
  0xb5   :  { %1950 = vmatprep.subr.bf16.mxu1 %v2236_v0 }
  0xb7   :  { %1929 = vmatpush3.bf16.msra.mxu0 %v2221_v49  ;;  %v200_v49 = vrot.slane %v187_v13, %v199_v46 }
  0xb8   :  { %1930 = vmatprep.subr.bf16.mxu0 %v2222_v50  ;;  %1951 = vmatpush3.bf16.msra.mxu1 %v2237_v1 }
  0xb9   :  { %1952 = vmatprep.subr.bf16.mxu1 %v2238_v2 }
  0xbb   :  { %1931 = vmatpush3.bf16.msra.mxu0 %v2223_v51 }
  0xbc   :  { %1932 = vmatprep.subr.bf16.mxu0 %v2224_v52  ;;  %1953 = vmatpush3.bf16.msra.mxu1 %v2239_v3 }
  0xbd   :  { %1954 = vmatprep.subr.bf16.mxu1 %v2240_v6 }
  0xbf   :  { %1933 = vmatpush3.bf16.msra.mxu0 %v2225_v53 }
  0xc0   :  { %1955 = vmatpush3.bf16.msra.mxu1 %v2241_v7 }
 0x102   :  { %v1069_v9 = vpop.f32.mrf.mxu0 }
 0x103   :  { %v1112_v16 = vpop.f32.mrf.mxu1  ;;  %v1070_v22 = vadd.f32 %v1069_v9, %v192_v18 }
 0x104   :  { %v1071_v11 = vpop.f32.mrf.mxu0 }
 0x105   :  { %v1114_v19 = vpop.f32.mrf.mxu1  ;;  %v1072_v14 = vadd.f32 %v1071_v11, %v196_v4  ;;  %v1113_v29 = vadd.f32 %v1112_v16, %v1070_v22 }
 0x106   :  { %v1073_v17 = vpop.f32.mrf.mxu0 }
 0x107   :  { %v1074_v21 = vadd.f32 %v1073_v17, %v192_v18  ;;  %v1116_v23 = vpop.f32.mrf.mxu1  ;;  %v1115_v27 = vadd.f32 %v1114_v19, %v1072_v14  ;;  %v1873_v19 = vld [vmem:[%s2898_s4] ss:$0 sm:$0xff] }
 0x108   :  { %v1075_v20 = vpop.f32.mrf.mxu0 }
 0x109   :  { %v1076_v25 = vadd.f32 %v1075_v20, %v196_v4  ;;  %v1117_v28 = vadd.f32 %v1116_v23, %v1074_v21  ;;  %v1118_v30 = vpop.f32.mrf.mxu1 }
 0x10b   :  { %v1119_v32 = vadd.f32 %v1118_v30, %v1076_v25 }
 0x122   :  { %v1155_v24 = vpop.f32.mrf.mxu0 }
 0x123   :  { %v1156_v35 = vadd.f32 %v1155_v24, %v1113_v29 }
 0x124   :  { %v1157_v26 = vpop.f32.mrf.mxu0 }
 0x125   :  { %v1158_v33 = vadd.f32 %v1157_v26, %v1115_v27  ;;  %v1293_v42 = vmax.f32 %v1156_v35, 0.0 }
 0x126   :  { %v1159_v31 = vpop.f32.mrf.mxu0 }
 0x127   :  { %v1160_v34 = vadd.f32 %v1159_v31, %v1117_v28  ;;  %v1294_v40 = vmax.f32 %v1158_v33, 0.0 }
 0x128   :  { %v1161_v36 = vpop.f32.mrf.mxu0 }
 0x129   :  { %v1162_v37 = vadd.f32 %v1161_v36, %v1119_v32  ;;  %v1297_v38 = vmax.f32 %v1160_v34, 0.0 }
 0x12b   :  { %v1298_v41 = vmax.f32 %v1162_v37, 0.0  ;;  %v1914_v44 = vpack.c.bf16 %v1297_v38, %v1293_v42 }
 0x12d   :  { %v1915_v43 = vpack.c.bf16 %v1298_v41, %v1294_v40 }
 0x12f   :  { %1648 = vmatprep.mubr.bf16.mxu0 %v1915_v43 }
 0x130   :  { %1649 = vmatmul.mubr.bf16.vlgmr.msra.gmra.mxu0 %v1914_v44 }
 0x143   :  { %v1198_v45 = vpop.f32.mrf.mxu1 }
 0x144   :  { %v1199_v54 = vadd.f32 %v1198_v45, %v200_v49 }
 0x145   :  { %v1200_v5 = vpop.f32.mrf.mxu1 }
 0x146   :  { %v1201_v53 = vadd.f32 %v1200_v5, %v204_v48 }
 0x147   :  { %v1202_v47 = vpop.f32.mrf.mxu1 }
 0x148   :  { %v1203_v57 = vadd.f32 %v1202_v47, %v200_v49 }
 0x149   :  { %v1204_v50 = vpop.f32.mrf.mxu1 }
 0x14a   :  { %v1205_v62 = vadd.f32 %v1204_v50, %v204_v48 }
 0x162   :  { %v1241_v51 = vpop.f32.mrf.mxu0 }
 0x163   :  { %v1284_v52 = vpop.f32.mrf.mxu1  ;;  %v1242_v59 = vadd.f32 %v1241_v51, %v1199_v54 }
 0x164   :  { %v1243_v55 = vpop.f32.mrf.mxu0 }
 0x165   :  { %v1286_v56 = vpop.f32.mrf.mxu1  ;;  %v1244_v58 = vadd.f32 %v1243_v55, %v1201_v53  ;;  %v1285_v6 = vadd.f32 %v1284_v52, %v1242_v59 }
 0x166   :  { %v1245_v60 = vpop.f32.mrf.mxu0 }
 0x167   :  { %v1288_v61 = vpop.f32.mrf.mxu1  ;;  %v1246_v63 = vadd.f32 %v1245_v60, %v1203_v57  ;;  %v1287_v1 = vadd.f32 %v1286_v56, %v1244_v58  ;;  %v1295_v12 = vmax.f32 %v1285_v6, 0.0 }
 0x168   :  { %v1247_v0 = vpop.f32.mrf.mxu0 }
 0x169   :  { %v1289_v2 = vadd.f32 %v1288_v61, %v1246_v63  ;;  %v1248_v3 = vadd.f32 %v1247_v0, %v1205_v62  ;;  %v1290_v7 = vpop.f32.mrf.mxu1  ;;  %v1296_v10 = vmax.f32 %v1287_v1, 0.0 }
 0x16b   :  { %v1291_v8 = vadd.f32 %v1290_v7, %v1248_v3  ;;  %v1299_v9 = vmax.f32 %v1289_v2, 0.0 }
 0x16d   :  { %v1300_v11 = vmax.f32 %v1291_v8, 0.0  ;;  %v1916_v15 = vpack.c.bf16 %v1299_v9, %v1295_v12 }
 0x16f   :  { %v1917_v13 = vpack.c.bf16 %v1300_v11, %v1296_v10 }
 0x171   :  { %1689 = vmatprep.mubr.bf16.mxu1 %v1917_v13 }
 0x172   :  { %1690 = vmatmul.mubr.bf16.vlgmr.msra.gmra.mxu1 %v1916_v15 }
 0x1f0   :  { %v1934_v16 = vpop.f32.mrf.mxu0 }
 0x1f2   :  { %v1935_v17 = vpop.f32.mrf.mxu0 }
 0x1f3   :  { %v1936_v18 = vadd.f32 %v1935_v17, %v1934_v16 }
 0x1f4   :  { %v1937_v4 = vpop.f32.mrf.mxu0 }
 0x1f5   :  { %v1651_v22 = vadd.f32 %v1936_v18, %v1873_v19 }
 0x1f6   :  { %v1938_v20 = vpop.f32.mrf.mxu0 }
 0x1f7   :  { %v1939_v23 = vadd.f32 %v1938_v20, %v1937_v4 }
 0x1f9   :  { %v1654_v28 = vadd.f32 %v1939_v23, %v1873_v19 }
 0x232   :  { %v1956_v14 = vpop.f32.mrf.mxu1 }
 0x234   :  { %v1957_v21 = vpop.f32.mrf.mxu1 }
 0x235   :  { %v1958_v24 = vadd.f32 %v1957_v21, %v1956_v14 }
 0x236   :  { %v1959_v25 = vpop.f32.mrf.mxu1 }
 0x237   :  { %v1692_v26 = vadd.f32 %v1958_v24, %v1651_v22 }
 0x238   :  { %v1960_v27 = vpop.f32.mrf.mxu1 }
 0x239   :  { %1698 = vst [vmem:[%s2899_s5] sm:$0xff] %v1692_v26  ;;  %v1961_v29 = vadd.f32 %v1960_v27, %v1959_v25 }
 0x23b   :  { %v1695_v30 = vadd.f32 %v1961_v29, %v1654_v28 }
 0x23d   :  { %1699 = vst [vmem:[%s2899_s5 + $0x8] sm:$0xff] %v1695_v30 }

</bundles_post_ra>
